<compile_context>
chip_gen: v7x
topology: tpu7x:2x2x1
jax: 0.10.0
libtpu: 0.0.40
codegen_flags: <defaults>
</compile_context>

<pallas_src>
import functools

import jax
import jax.numpy as jnp
from jax.experimental import pallas as pl
from jax.experimental.pallas import tpu as pltpu


LANE = 128     # lane-axis alignment (last dim)
SUBLANE = 16   # sublane alignment for bf16 activations (second-to-last dim)


def _round_up(x, m):
    return ((x + m - 1) // m) * m


def _vmem_budget_bytes():
    """Generation-aware usable-VMEM budget (v5e/v6e ~128 MiB, v7x 64 MiB)."""
    try:
        cap = pltpu.get_tpu_info().vmem_capacity_bytes
    except Exception:
        cap = 64 * 1024 * 1024          # conservative fallback (v7x per-TC)
    return int(cap * 0.85)              # headroom for compiler scratch


def _vmem_estimate(tile_m, dims_pad, *, w_buffers):
    """Rough per-step VMEM residency (bytes) of the fused-MLP kernel."""
    in_pad, out_pad = dims_pad[0], dims_pad[-1]
    max_d = max(dims_pad)
    weights = sum(dims_pad[l] * dims_pad[l + 1] * 2
                  for l in range(len(dims_pad) - 1))
    biases = sum(dims_pad[l + 1] * 4 for l in range(len(dims_pad) - 1))
    return (w_buffers * (weights + biases)
            + 2 * tile_m * in_pad * 2       # bf16 input block, double-buffered
            + 2 * tile_m * out_pad * 4      # f32 output block, double-buffered
            + 3 * tile_m * max_d * 4)       # live f32 h (x2) + bf16 cast copy


# ----------------------------------------------------------------------------
# Pallas kernel: fused MLP (Linear -> SiLU -> ... -> Linear); one grid step =
# one (atom-type key, M-tile of samples) work item from the compacted list.
# ----------------------------------------------------------------------------
def _fused_mlp_kernel(n_layers, wk_ref, wt_ref, x_ref, *refs):
    # wk_ref / wt_ref are the SMEM work lists; only the index_maps use them.
    del wk_ref, wt_ref
    o_ref = refs[-1]
    wb = refs[:-1]          # (w0, b0, w1, b1, ..., w_{L-1}, b_{L-1})

    h = x_ref[...]                                          # bf16 [tile_m, in_pad]
    for layer in range(n_layers):
        w = wb[2 * layer][...]                              # bf16 [K_pad, N_pad]
        b = wb[2 * layer + 1][...].astype(jnp.float32)      # f32  [1,  N_pad]
        # bf16 MXU operands, f32 accumulation.
        h = jnp.dot(h.astype(jnp.bfloat16), w,
                    preferred_element_type=jnp.float32) + b
        if layer < n_layers - 1:
            # SiLU(x) = x * sigmoid(x): sigmoid -> EUP slot, mul -> VPU slot.
            # Kept in f32 (correct on v5e, which has no bf16 VPU/EUP).
            h = h * jax.nn.sigmoid(h)
    # NOTE: padded sample rows carry "bias pushed through the MLP" values;
    # the wrapper slices them off. Mask here if the padded tensor ever escapes.
    o_ref[...] = h.astype(o_ref.dtype)


def fused_mlp_all_keys(x_stacked, w_stacked, b_stacked, work_key, work_tile,
                       *, tile_m, single_buffer_weights=True):
    """Apply the per-key MLPs to all keys in one pallas_call.

    x_stacked : bf16 [n_keys, n_samp_pad, in_pad]
    w_stacked : list of bf16 [n_keys, d_l_pad, d_{l+1}_pad]
    b_stacked : list of f32  [n_keys, 1,       d_{l+1}_pad]
    work_key / work_tile : int32 [n_work] compacted, key-major work list.
    """
    n_keys, n_samp_pad, in_pad = x_stacked.shape
    n_layers = len(w_stacked)
    out_pad = w_stacked[-1].shape[-1]
    n_work = int(work_key.shape[0])
    assert n_samp_pad % tile_m == 0           # guaranteed by the wrapper

    dims_pad = [in_pad] + [w.shape[-1] for w in w_stacked]
    budget = _vmem_budget_bytes()

    flat_args = [work_key, work_tile, x_stacked]
    for w, b in zip(w_stacked, b_stacked):
        flat_args += [w, b]

    kernel = functools.partial(_fused_mlp_kernel, n_layers)

    def build(weight_pipeline_mode):
        w_bufs = 1 if weight_pipeline_mode is not None else 2

        def wb_spec(shape):
            imap = lambda i, wk, wt: (wk[i], 0, 0)
            if weight_pipeline_mode is None:
                return pl.BlockSpec((None,) + tuple(shape), imap)
            return pl.BlockSpec((None,) + tuple(shape), imap,
                                pipeline_mode=weight_pipeline_mode)

        in_specs = [pl.BlockSpec((None, tile_m, in_pad),
                                 lambda i, wk, wt: (wk[i], wt[i], 0))]
        for w, b in zip(w_stacked, b_stacked):
            in_specs.append(wb_spec(w.shape[1:]))
            in_specs.append(wb_spec(b.shape[1:]))
        out_spec = pl.BlockSpec((None, tile_m, out_pad),
                                lambda i, wk, wt: (wk[i], wt[i], 0))

        est = _vmem_estimate(tile_m, dims_pad, w_buffers=w_bufs)
        vmem_limit = int(min(budget, max(2 * est, 32 * 1024 * 1024)))

        return pl.pallas_call(
            kernel,
            out_shape=jax.ShapeDtypeStruct((n_keys, n_samp_pad, out_pad),
                                           jnp.float32),
            grid_spec=pltpu.PrefetchScalarGridSpec(
                num_scalar_prefetch=2,       # work_key, work_tile -> SMEM
                grid=(n_work,),
                in_specs=in_specs,
                out_specs=out_spec,
            ),
            compiler_params=pltpu.CompilerParams(
                dimension_semantics=("parallel",),
                vmem_limit_bytes=vmem_limit,
            ),
        )

    if single_buffer_weights:
        try:
            # Single-buffered weights/biases (they change only at key
            # boundaries); main VMEM win on v7x's 64 MiB.
            return build(pl.Buffered(1))(*flat_args)
        except Exception:
            pass  # pipeline_mode / Buffered(1) unsupported -> default 2-deep
    return build(None)(*flat_args)


# ----------------------------------------------------------------------------
# SoapDosNet (forward only), parameters initialized deterministically in-script
# ----------------------------------------------------------------------------
class SoapDosNetPallas:
    """Mirrors SoapDosNet._nn: one MLP per key (atom type), fused on TPU."""

    def __init__(self, atom_types, in_features, out_features_per_key,
                 hidden_layer_widths, key):
        self.atom_types = list(atom_types)
        self.in_features = in_features
        self.out_features_per_key = list(out_features_per_key)
        n_keys = len(self.atom_types)
        n_layers = len(hidden_layer_widths) + 1

        # Unpadded per-key parameters (f32), Linear-like init, kept for the
        # pure-JAX reference.
        self.params = []
        for key_i in range(n_keys):
            widths = list(hidden_layer_widths) + [out_features_per_key[key_i]]
            ws, bs = [], []
            prev = in_features
            for width in widths:
                key, kw, kb = jax.random.split(key, 3)
                bound = 1.0 / jnp.sqrt(prev)
                ws.append(jax.random.uniform(
                    kw, (prev, width), jnp.float32, -bound, bound))
                bs.append(jax.random.uniform(
                    kb, (1, width), jnp.float32, -bound, bound))
                prev = width
            self.params.append((ws, bs))

        # Lane-align every layer dim to a multiple of 128 and stack across
        # keys once, up front (weights in bf16 for the MXU, biases in f32).
        dims = ([in_features] + list(hidden_layer_widths)
                + [max(out_features_per_key)])
        self.dims_pad = [_round_up(d, LANE) for d in dims]
        self.in_pad = self.dims_pad[0]
        self.out_pad = self.dims_pad[-1]

        self.w_stacked, self.b_stacked = [], []
        for l in range(n_layers):
            kp, np_ = self.dims_pad[l], self.dims_pad[l + 1]
            w_l = [jnp.pad(self.params[k][0][l].astype(jnp.bfloat16),
                           ((0, kp - self.params[k][0][l].shape[0]),
                            (0, np_ - self.params[k][0][l].shape[1])))
                   for k in range(n_keys)]
            b_l = [jnp.pad(self.params[k][1][l],
                           ((0, 0), (0, np_ - self.params[k][1][l].shape[1])))
                   for k in range(n_keys)]
            self.w_stacked.append(jnp.stack(w_l, axis=0))
            self.b_stacked.append(jnp.stack(b_l, axis=0))

    def forward(self, descriptor_blocks):
        """descriptor_blocks: dict {atom_type: [n_samples, in_features]}."""
        n_keys = len(self.atom_types)
        n_samples = [descriptor_blocks[at].shape[0] for at in self.atom_types]
        max_samp = max(n_samples)

        # Budget-driven M tile: largest candidate whose resident blocks fit
        # the generation's VMEM, but no larger than the biggest per-key block
        # actually needs.
        budget = _vmem_budget_bytes()
        tile_cap = 16
        for cand in (16, 32, 64, 128, 256, 512, 1024):
            if _vmem_estimate(cand, self.dims_pad, w_buffers=2) <= 0.7 * budget:
                tile_cap = cand
        tile_m = max(16, min(tile_cap, _round_up(max_samp, SUBLANE)))

        n_tiles = [max(1, -(-n // tile_m)) for n in n_samples]
        n_samp_pad = tile_m * max(n_tiles)

        # Compacted, key-major (key, tile) work list: only tiles containing
        # real samples are visited; weights' block index changes only at key
        # boundaries so they are not re-DMA'd within a key.
        work = [(k, t) for k in range(n_keys) for t in range(n_tiles[k])]
        work_key = jnp.asarray([k for k, _ in work], jnp.int32)
        work_tile = jnp.asarray([t for _, t in work], jnp.int32)

        # bf16 activations: single pad + stack per key (no full-array .set).
        x_stacked = jnp.stack([
            jnp.pad(descriptor_blocks[at].astype(jnp.bfloat16),
                    ((0, n_samp_pad - n_samples[k]),
                     (0, self.in_pad - self.in_features)))
            for k, at in enumerate(self.atom_types)], axis=0)

        out_padded = fused_mlp_all_keys(
            x_stacked, self.w_stacked, self.b_stacked, work_key, work_tile,
            tile_m=tile_m)

        return {at: out_padded[k, :n_samples[k], :self.out_features_per_key[k]]
                for k, at in enumerate(self.atom_types)}


# ----------------------------------------------------------------------------
# Pure-JAX reference (mirrors the kernel numerics: bf16 MXU operands, f32 acc)
# ----------------------------------------------------------------------------
def _mlp_ref(x, weights, biases):
    h = x.astype(jnp.float32)
    for i, (w, b) in enumerate(zip(weights, biases)):
        h = jnp.dot(h.astype(jnp.bfloat16), w.astype(jnp.bfloat16),
                    preferred_element_type=jnp.float32) + b
        if i < len(weights) - 1:
            h = h * jax.nn.sigmoid(h)
    return h


if __name__ == "__main__":
    key = jax.random.PRNGKey(0)

    # Small, module-consistent shapes:
    atom_types = [1, 8]                 # two keys -> two per-key MLPs (ModuleMap)
    in_features = 32                    # SOAP power-spectrum feature dim (synthetic)
    hidden_layer_widths = [64, 64]      # hidden_layer_widths argument
    out_features_per_key = [128, 96]    # len(out_properties[key]) = DOS grid pts
    n_samples_per_key = {1: 16, 8: 11}  # atomic environments per atom type

    key, k_model = jax.random.split(key)
    model = SoapDosNetPallas(
        atom_types, in_features, out_features_per_key,
        hidden_layer_widths, k_model)

    # Synthetic descriptor blocks (stand-in for compute_descriptor()'s output).
    descriptor_blocks = {}
    for at in atom_types:
        key, kx = jax.random.split(key)
        descriptor_blocks[at] = jax.random.normal(
            kx, (n_samples_per_key[at], in_features), jnp.float32)

    out = model.forward(descriptor_blocks)
    out = jax.tree_util.tree_map(jax.block_until_ready, out)

    # Validate against the pure-JAX reference.
    for key_i, at in enumerate(atom_types):
        ws, bs = model.params[key_i]
        ref = _mlp_ref(descriptor_blocks[at], ws, bs)
        assert out[at].shape == (n_samples_per_key[at],
                                 out_features_per_key[key_i]), out[at].shape
        assert jnp.allclose(out[at], ref, atol=1e-3, rtol=1e-3), (
            f"mismatch for atom type {at}: "
            f"max abs err = {jnp.max(jnp.abs(out[at] - ref))}")

    print("KERNEL_OK")
</pallas_src>

<mosaic_0001>
module attributes {stable_mosaic.version = 11 : i64} {
  func.func @_fused_mlp_kernel(%arg0: i32, %arg1: memref<2xi32, #tpu.memory_space<smem>>, %arg2: memref<2xi32, #tpu.memory_space<smem>>, %arg3: memref<1x16x128xbf16, #tpu.memory_space<vmem>>, %arg4: memref<1x128x128xbf16, #tpu.memory_space<vmem>>, %arg5: memref<1x1x128xf32, #tpu.memory_space<vmem>>, %arg6: memref<1x128x128xbf16, #tpu.memory_space<vmem>>, %arg7: memref<1x1x128xf32, #tpu.memory_space<vmem>>, %arg8: memref<1x128x128xbf16, #tpu.memory_space<vmem>>, %arg9: memref<1x1x128xf32, #tpu.memory_space<vmem>>, %arg10: memref<1x16x128xf32, #tpu.memory_space<vmem>>) attributes {dimension_semantics = [#tpu.dimension_semantics<parallel>], iteration_bounds = array<i64: 2>, scalar_prefetch = 2 : i64, scratch_operands = 0 : i64, tpu.core_type = #tpu.core_type<tc>, window_params = [{transform_indices = @transform_0, window_bounds = array<i64: 1, 16, 128>}, {pipeline_mode = #tpu.pipeline_mode<synchronous>, transform_indices = @transform_1, window_bounds = array<i64: 1, 128, 128>}, {pipeline_mode = #tpu.pipeline_mode<synchronous>, transform_indices = @transform_2, window_bounds = array<i64: 1, 1, 128>}, {pipeline_mode = #tpu.pipeline_mode<synchronous>, transform_indices = @transform_3, window_bounds = array<i64: 1, 128, 128>}, {pipeline_mode = #tpu.pipeline_mode<synchronous>, transform_indices = @transform_4, window_bounds = array<i64: 1, 1, 128>}, {pipeline_mode = #tpu.pipeline_mode<synchronous>, transform_indices = @transform_5, window_bounds = array<i64: 1, 128, 128>}, {pipeline_mode = #tpu.pipeline_mode<synchronous>, transform_indices = @transform_6, window_bounds = array<i64: 1, 1, 128>}, {transform_indices = @transform_7, window_bounds = array<i64: 1, 16, 128>}]} {
    %c0 = arith.constant 0 : index
    %c0_0 = arith.constant 0 : index
    %c0_1 = arith.constant 0 : index
    %0 = vector.load %arg3[%c0, %c0_0, %c0_1] : memref<1x16x128xbf16, #tpu.memory_space<vmem>>, vector<1x16x128xbf16>
    %1 = vector.shape_cast %0 : vector<1x16x128xbf16> to vector<16x128xbf16>
    %c0_2 = arith.constant 0 : index
    %c0_3 = arith.constant 0 : index
    %c0_4 = arith.constant 0 : index
    %2 = vector.load %arg4[%c0_2, %c0_3, %c0_4] : memref<1x128x128xbf16, #tpu.memory_space<vmem>>, vector<1x128x128xbf16>
    %3 = vector.shape_cast %2 : vector<1x128x128xbf16> to vector<128x128xbf16>
    %c0_5 = arith.constant 0 : index
    %c0_6 = arith.constant 0 : index
    %c0_7 = arith.constant 0 : index
    %4 = vector.load %arg5[%c0_5, %c0_6, %c0_7] : memref<1x1x128xf32, #tpu.memory_space<vmem>>, vector<1x1x128xf32>
    %5 = vector.shape_cast %4 : vector<1x1x128xf32> to vector<1x128xf32>
    %cst = arith.constant dense<0.000000e+00> : vector<16x128xf32>
    %6 = tpu.matmul %1, %3, %cst {dimension_numbers = #tpu.dot_dimension_numbers<[1], [0], [0], [1], [0, 0, 1, 1], [], []>} : vector<16x128xbf16>, vector<128x128xbf16>, vector<16x128xf32> -> vector<16x128xf32>
    %7 = vector.broadcast %5 : vector<1x128xf32> to vector<16x128xf32>
    %8 = arith.addf %6, %7 : vector<16x128xf32>
    %9 = arith.negf %8 : vector<16x128xf32>
    %10 = math.exp %9 : vector<16x128xf32>
    %cst_8 = arith.constant 1.000000e+00 : f32
    %11 = vector.broadcast %cst_8 : f32 to vector<16x128xf32>
    %12 = arith.addf %11, %10 : vector<16x128xf32>
    %13 = arith.divf %11, %12 : vector<16x128xf32>
    %14 = arith.mulf %8, %13 : vector<16x128xf32>
    %c0_9 = arith.constant 0 : index
    %c0_10 = arith.constant 0 : index
    %c0_11 = arith.constant 0 : index
    %15 = vector.load %arg6[%c0_9, %c0_10, %c0_11] : memref<1x128x128xbf16, #tpu.memory_space<vmem>>, vector<1x128x128xbf16>
    %16 = vector.shape_cast %15 : vector<1x128x128xbf16> to vector<128x128xbf16>
    %c0_12 = arith.constant 0 : index
    %c0_13 = arith.constant 0 : index
    %c0_14 = arith.constant 0 : index
    %17 = vector.load %arg7[%c0_12, %c0_13, %c0_14] : memref<1x1x128xf32, #tpu.memory_space<vmem>>, vector<1x1x128xf32>
    %18 = vector.shape_cast %17 : vector<1x1x128xf32> to vector<1x128xf32>
    %19 = arith.truncf %14 : vector<16x128xf32> to vector<16x128xbf16>
    %cst_15 = arith.constant dense<0.000000e+00> : vector<16x128xf32>
    %20 = tpu.matmul %19, %16, %cst_15 {dimension_numbers = #tpu.dot_dimension_numbers<[1], [0], [0], [1], [0, 0, 1, 1], [], []>} : vector<16x128xbf16>, vector<128x128xbf16>, vector<16x128xf32> -> vector<16x128xf32>
    %21 = vector.broadcast %18 : vector<1x128xf32> to vector<16x128xf32>
    %22 = arith.addf %20, %21 : vector<16x128xf32>
    %23 = arith.negf %22 : vector<16x128xf32>
    %24 = math.exp %23 : vector<16x128xf32>
    %cst_16 = arith.constant 1.000000e+00 : f32
    %25 = vector.broadcast %cst_16 : f32 to vector<16x128xf32>
    %26 = arith.addf %25, %24 : vector<16x128xf32>
    %27 = arith.divf %25, %26 : vector<16x128xf32>
    %28 = arith.mulf %22, %27 : vector<16x128xf32>
    %c0_17 = arith.constant 0 : index
    %c0_18 = arith.constant 0 : index
    %c0_19 = arith.constant 0 : index
    %29 = vector.load %arg8[%c0_17, %c0_18, %c0_19] : memref<1x128x128xbf16, #tpu.memory_space<vmem>>, vector<1x128x128xbf16>
    %30 = vector.shape_cast %29 : vector<1x128x128xbf16> to vector<128x128xbf16>
    %c0_20 = arith.constant 0 : index
    %c0_21 = arith.constant 0 : index
    %c0_22 = arith.constant 0 : index
    %31 = vector.load %arg9[%c0_20, %c0_21, %c0_22] : memref<1x1x128xf32, #tpu.memory_space<vmem>>, vector<1x1x128xf32>
    %32 = vector.shape_cast %31 : vector<1x1x128xf32> to vector<1x128xf32>
    %33 = arith.truncf %28 : vector<16x128xf32> to vector<16x128xbf16>
    %cst_23 = arith.constant dense<0.000000e+00> : vector<16x128xf32>
    %34 = tpu.matmul %33, %30, %cst_23 {dimension_numbers = #tpu.dot_dimension_numbers<[1], [0], [0], [1], [0, 0, 1, 1], [], []>} : vector<16x128xbf16>, vector<128x128xbf16>, vector<16x128xf32> -> vector<16x128xf32>
    %35 = vector.broadcast %32 : vector<1x128xf32> to vector<16x128xf32>
    %36 = arith.addf %34, %35 : vector<16x128xf32>
    %c0_24 = arith.constant 0 : index
    %c0_25 = arith.constant 0 : index
    %c0_26 = arith.constant 0 : index
    %37 = vector.load %arg10[%c0_24, %c0_25, %c0_26] : memref<1x16x128xf32, #tpu.memory_space<vmem>>, vector<1x16x128xf32>
    %38 = vector.shape_cast %37 : vector<1x16x128xf32> to vector<16x128xf32>
    %39 = vector.shape_cast %36 : vector<16x128xf32> to vector<1x16x128xf32>
    tpu.vector_store %arg10[%c0_24, %c0_25, %c0_26], %39 {strides = array<i32>} : memref<1x16x128xf32, #tpu.memory_space<vmem>>, vector<1x16x128xf32>,
    return
  }
  func.func @transform_0(%arg0: i32, %arg1: memref<2xi32, #tpu.memory_space<smem>>, %arg2: memref<2xi32, #tpu.memory_space<smem>>) -> (i32, i32, i32) {
    %0 = arith.index_cast %arg0 : i32 to index
    %1 = memref.load %arg1[%0] : memref<2xi32, #tpu.memory_space<smem>>
    %2 = arith.index_cast %arg0 : i32 to index
    %3 = memref.load %arg2[%2] : memref<2xi32, #tpu.memory_space<smem>>
    %c0_i32 = arith.constant 0 : i32
    %c0_i32_0 = arith.constant 0 : i32
    return %1, %3, %c0_i32 : i32, i32, i32
  }
  func.func @transform_1(%arg0: i32, %arg1: memref<2xi32, #tpu.memory_space<smem>>, %arg2: memref<2xi32, #tpu.memory_space<smem>>) -> (i32, i32, i32) {
    %0 = arith.index_cast %arg0 : i32 to index
    %1 = memref.load %arg1[%0] : memref<2xi32, #tpu.memory_space<smem>>
    %c0_i32 = arith.constant 0 : i32
    %c0_i32_0 = arith.constant 0 : i32
    %c0_i32_1 = arith.constant 0 : i32
    return %1, %c0_i32, %c0_i32_0 : i32, i32, i32
  }
  func.func @transform_2(%arg0: i32, %arg1: memref<2xi32, #tpu.memory_space<smem>>, %arg2: memref<2xi32, #tpu.memory_space<smem>>) -> (i32, i32, i32) {
    %0 = arith.index_cast %arg0 : i32 to index
    %1 = memref.load %arg1[%0] : memref<2xi32, #tpu.memory_space<smem>>
    %c0_i32 = arith.constant 0 : i32
    %c0_i32_0 = arith.constant 0 : i32
    %c0_i32_1 = arith.constant 0 : i32
    return %1, %c0_i32, %c0_i32_0 : i32, i32, i32
  }
  func.func @transform_3(%arg0: i32, %arg1: memref<2xi32, #tpu.memory_space<smem>>, %arg2: memref<2xi32, #tpu.memory_space<smem>>) -> (i32, i32, i32) {
    %0 = arith.index_cast %arg0 : i32 to index
    %1 = memref.load %arg1[%0] : memref<2xi32, #tpu.memory_space<smem>>
    %c0_i32 = arith.constant 0 : i32
    %c0_i32_0 = arith.constant 0 : i32
    %c0_i32_1 = arith.constant 0 : i32
    return %1, %c0_i32, %c0_i32_0 : i32, i32, i32
  }
  func.func @transform_4(%arg0: i32, %arg1: memref<2xi32, #tpu.memory_space<smem>>, %arg2: memref<2xi32, #tpu.memory_space<smem>>) -> (i32, i32, i32) {
    %0 = arith.index_cast %arg0 : i32 to index
    %1 = memref.load %arg1[%0] : memref<2xi32, #tpu.memory_space<smem>>
    %c0_i32 = arith.constant 0 : i32
    %c0_i32_0 = arith.constant 0 : i32
    %c0_i32_1 = arith.constant 0 : i32
    return %1, %c0_i32, %c0_i32_0 : i32, i32, i32
  }
  func.func @transform_5(%arg0: i32, %arg1: memref<2xi32, #tpu.memory_space<smem>>, %arg2: memref<2xi32, #tpu.memory_space<smem>>) -> (i32, i32, i32) {
    %0 = arith.index_cast %arg0 : i32 to index
    %1 = memref.load %arg1[%0] : memref<2xi32, #tpu.memory_space<smem>>
    %c0_i32 = arith.constant 0 : i32
    %c0_i32_0 = arith.constant 0 : i32
    %c0_i32_1 = arith.constant 0 : i32
    return %1, %c0_i32, %c0_i32_0 : i32, i32, i32
  }
  func.func @transform_6(%arg0: i32, %arg1: memref<2xi32, #tpu.memory_space<smem>>, %arg2: memref<2xi32, #tpu.memory_space<smem>>) -> (i32, i32, i32) {
    %0 = arith.index_cast %arg0 : i32 to index
    %1 = memref.load %arg1[%0] : memref<2xi32, #tpu.memory_space<smem>>
    %c0_i32 = arith.constant 0 : i32
    %c0_i32_0 = arith.constant 0 : i32
    %c0_i32_1 = arith.constant 0 : i32
    return %1, %c0_i32, %c0_i32_0 : i32, i32, i32
  }
  func.func @transform_7(%arg0: i32, %arg1: memref<2xi32, #tpu.memory_space<smem>>, %arg2: memref<2xi32, #tpu.memory_space<smem>>) -> (i32, i32, i32) {
    %0 = arith.index_cast %arg0 : i32 to index
    %1 = memref.load %arg1[%0] : memref<2xi32, #tpu.memory_space<smem>>
    %2 = arith.index_cast %arg0 : i32 to index
    %3 = memref.load %arg2[%2] : memref<2xi32, #tpu.memory_space<smem>>
    %c0_i32 = arith.constant 0 : i32
    %c0_i32_0 = arith.constant 0 : i32
    return %1, %3, %c0_i32 : i32, i32, i32
  }
}

module attributes {stable_mosaic.version = 11 : i64} {
  func.func @_fused_mlp_kernel(%arg0: i32, %arg1: memref<2xi32, #tpu.memory_space<smem>>, %arg2: memref<2xi32, #tpu.memory_space<smem>>, %arg3: memref<1x16x128xbf16, #tpu.memory_space<vmem>>, %arg4: memref<1x128x128xbf16, #tpu.memory_space<vmem>>, %arg5: memref<1x1x128xf32, #tpu.memory_space<vmem>>, %arg6: memref<1x128x128xbf16, #tpu.memory_space<vmem>>, %arg7: memref<1x1x128xf32, #tpu.memory_space<vmem>>, %arg8: memref<1x128x128xbf16, #tpu.memory_space<vmem>>, %arg9: memref<1x1x128xf32, #tpu.memory_space<vmem>>, %arg10: memref<1x16x128xf32, #tpu.memory_space<vmem>>) attributes {dimension_semantics = [#tpu.dimension_semantics<parallel>], iteration_bounds = array<i64: 2>, scalar_prefetch = 2 : i64, scratch_operands = 0 : i64, tpu.core_type = #tpu.core_type<tc>, window_params = [{transform_indices = @transform_0, window_bounds = array<i64: 1, 16, 128>}, {transform_indices = @transform_1, window_bounds = array<i64: 1, 128, 128>}, {transform_indices = @transform_2, window_bounds = array<i64: 1, 1, 128>}, {transform_indices = @transform_3, window_bounds = array<i64: 1, 128, 128>}, {transform_indices = @transform_4, window_bounds = array<i64: 1, 1, 128>}, {transform_indices = @transform_5, window_bounds = array<i64: 1, 128, 128>}, {transform_indices = @transform_6, window_bounds = array<i64: 1, 1, 128>}, {transform_indices = @transform_7, window_bounds = array<i64: 1, 16, 128>}]} {
    %c0 = arith.constant 0 : index
    %c0_0 = arith.constant 0 : index
    %c0_1 = arith.constant 0 : index
    %0 = vector.load %arg3[%c0, %c0_0, %c0_1] : memref<1x16x128xbf16, #tpu.memory_space<vmem>>, vector<1x16x128xbf16>
    %1 = vector.shape_cast %0 : vector<1x16x128xbf16> to vector<16x128xbf16>
    %c0_2 = arith.constant 0 : index
    %c0_3 = arith.constant 0 : index
    %c0_4 = arith.constant 0 : index
    %2 = vector.load %arg4[%c0_2, %c0_3, %c0_4] : memref<1x128x128xbf16, #tpu.memory_space<vmem>>, vector<1x128x128xbf16>
    %3 = vector.shape_cast %2 : vector<1x128x128xbf16> to vector<128x128xbf16>
    %c0_5 = arith.constant 0 : index
    %c0_6 = arith.constant 0 : index
    %c0_7 = arith.constant 0 : index
    %4 = vector.load %arg5[%c0_5, %c0_6, %c0_7] : memref<1x1x128xf32, #tpu.memory_space<vmem>>, vector<1x1x128xf32>
    %5 = vector.shape_cast %4 : vector<1x1x128xf32> to vector<1x128xf32>
    %cst = arith.constant dense<0.000000e+00> : vector<16x128xf32>
    %6 = tpu.matmul %1, %3, %cst {dimension_numbers = #tpu.dot_dimension_numbers<[1], [0], [0], [1], [0, 0, 1, 1], [], []>} : vector<16x128xbf16>, vector<128x128xbf16>, vector<16x128xf32> -> vector<16x128xf32>
    %7 = vector.broadcast %5 : vector<1x128xf32> to vector<16x128xf32>
    %8 = arith.addf %6, %7 : vector<16x128xf32>
    %9 = arith.negf %8 : vector<16x128xf32>
    %10 = math.exp %9 : vector<16x128xf32>
    %cst_8 = arith.constant 1.000000e+00 : f32
    %11 = vector.broadcast %cst_8 : f32 to vector<16x128xf32>
    %12 = arith.addf %11, %10 : vector<16x128xf32>
    %13 = arith.divf %11, %12 : vector<16x128xf32>
    %14 = arith.mulf %8, %13 : vector<16x128xf32>
    %c0_9 = arith.constant 0 : index
    %c0_10 = arith.constant 0 : index
    %c0_11 = arith.constant 0 : index
    %15 = vector.load %arg6[%c0_9, %c0_10, %c0_11] : memref<1x128x128xbf16, #tpu.memory_space<vmem>>, vector<1x128x128xbf16>
    %16 = vector.shape_cast %15 : vector<1x128x128xbf16> to vector<128x128xbf16>
    %c0_12 = arith.constant 0 : index
    %c0_13 = arith.constant 0 : index
    %c0_14 = arith.constant 0 : index
    %17 = vector.load %arg7[%c0_12, %c0_13, %c0_14] : memref<1x1x128xf32, #tpu.memory_space<vmem>>, vector<1x1x128xf32>
    %18 = vector.shape_cast %17 : vector<1x1x128xf32> to vector<1x128xf32>
    %19 = arith.truncf %14 : vector<16x128xf32> to vector<16x128xbf16>
    %cst_15 = arith.constant dense<0.000000e+00> : vector<16x128xf32>
    %20 = tpu.matmul %19, %16, %cst_15 {dimension_numbers = #tpu.dot_dimension_numbers<[1], [0], [0], [1], [0, 0, 1, 1], [], []>} : vector<16x128xbf16>, vector<128x128xbf16>, vector<16x128xf32> -> vector<16x128xf32>
    %21 = vector.broadcast %18 : vector<1x128xf32> to vector<16x128xf32>
    %22 = arith.addf %20, %21 : vector<16x128xf32>
    %23 = arith.negf %22 : vector<16x128xf32>
    %24 = math.exp %23 : vector<16x128xf32>
    %cst_16 = arith.constant 1.000000e+00 : f32
    %25 = vector.broadcast %cst_16 : f32 to vector<16x128xf32>
    %26 = arith.addf %25, %24 : vector<16x128xf32>
    %27 = arith.divf %25, %26 : vector<16x128xf32>
    %28 = arith.mulf %22, %27 : vector<16x128xf32>
    %c0_17 = arith.constant 0 : index
    %c0_18 = arith.constant 0 : index
    %c0_19 = arith.constant 0 : index
    %29 = vector.load %arg8[%c0_17, %c0_18, %c0_19] : memref<1x128x128xbf16, #tpu.memory_space<vmem>>, vector<1x128x128xbf16>
    %30 = vector.shape_cast %29 : vector<1x128x128xbf16> to vector<128x128xbf16>
    %c0_20 = arith.constant 0 : index
    %c0_21 = arith.constant 0 : index
    %c0_22 = arith.constant 0 : index
    %31 = vector.load %arg9[%c0_20, %c0_21, %c0_22] : memref<1x1x128xf32, #tpu.memory_space<vmem>>, vector<1x1x128xf32>
    %32 = vector.shape_cast %31 : vector<1x1x128xf32> to vector<1x128xf32>
    %33 = arith.truncf %28 : vector<16x128xf32> to vector<16x128xbf16>
    %cst_23 = arith.constant dense<0.000000e+00> : vector<16x128xf32>
    %34 = tpu.matmul %33, %30, %cst_23 {dimension_numbers = #tpu.dot_dimension_numbers<[1], [0], [0], [1], [0, 0, 1, 1], [], []>} : vector<16x128xbf16>, vector<128x128xbf16>, vector<16x128xf32> -> vector<16x128xf32>
    %35 = vector.broadcast %32 : vector<1x128xf32> to vector<16x128xf32>
    %36 = arith.addf %34, %35 : vector<16x128xf32>
    %c0_24 = arith.constant 0 : index
    %c0_25 = arith.constant 0 : index
    %c0_26 = arith.constant 0 : index
    %37 = vector.load %arg10[%c0_24, %c0_25, %c0_26] : memref<1x16x128xf32, #tpu.memory_space<vmem>>, vector<1x16x128xf32>
    %38 = vector.shape_cast %37 : vector<1x16x128xf32> to vector<16x128xf32>
    %39 = vector.shape_cast %36 : vector<16x128xf32> to vector<1x16x128xf32>
    tpu.vector_store %arg10[%c0_24, %c0_25, %c0_26], %39 {strides = array<i32>} : memref<1x16x128xf32, #tpu.memory_space<vmem>>, vector<1x16x128xf32>,
    return
  }
  func.func @transform_0(%arg0: i32, %arg1: memref<2xi32, #tpu.memory_space<smem>>, %arg2: memref<2xi32, #tpu.memory_space<smem>>) -> (i32, i32, i32) {
    %0 = arith.index_cast %arg0 : i32 to index
    %1 = memref.load %arg1[%0] : memref<2xi32, #tpu.memory_space<smem>>
    %2 = arith.index_cast %arg0 : i32 to index
    %3 = memref.load %arg2[%2] : memref<2xi32, #tpu.memory_space<smem>>
    %c0_i32 = arith.constant 0 : i32
    %c0_i32_0 = arith.constant 0 : i32
    return %1, %3, %c0_i32 : i32, i32, i32
  }
  func.func @transform_1(%arg0: i32, %arg1: memref<2xi32, #tpu.memory_space<smem>>, %arg2: memref<2xi32, #tpu.memory_space<smem>>) -> (i32, i32, i32) {
    %0 = arith.index_cast %arg0 : i32 to index
    %1 = memref.load %arg1[%0] : memref<2xi32, #tpu.memory_space<smem>>
    %c0_i32 = arith.constant 0 : i32
    %c0_i32_0 = arith.constant 0 : i32
    %c0_i32_1 = arith.constant 0 : i32
    return %1, %c0_i32, %c0_i32_0 : i32, i32, i32
  }
  func.func @transform_2(%arg0: i32, %arg1: memref<2xi32, #tpu.memory_space<smem>>, %arg2: memref<2xi32, #tpu.memory_space<smem>>) -> (i32, i32, i32) {
    %0 = arith.index_cast %arg0 : i32 to index
    %1 = memref.load %arg1[%0] : memref<2xi32, #tpu.memory_space<smem>>
    %c0_i32 = arith.constant 0 : i32
    %c0_i32_0 = arith.constant 0 : i32
    %c0_i32_1 = arith.constant 0 : i32
    return %1, %c0_i32, %c0_i32_0 : i32, i32, i32
  }
  func.func @transform_3(%arg0: i32, %arg1: memref<2xi32, #tpu.memory_space<smem>>, %arg2: memref<2xi32, #tpu.memory_space<smem>>) -> (i32, i32, i32) {
    %0 = arith.index_cast %arg0 : i32 to index
    %1 = memref.load %arg1[%0] : memref<2xi32, #tpu.memory_space<smem>>
    %c0_i32 = arith.constant 0 : i32
    %c0_i32_0 = arith.constant 0 : i32
    %c0_i32_1 = arith.constant 0 : i32
    return %1, %c0_i32, %c0_i32_0 : i32, i32, i32
  }
  func.func @transform_4(%arg0: i32, %arg1: memref<2xi32, #tpu.memory_space<smem>>, %arg2: memref<2xi32, #tpu.memory_space<smem>>) -> (i32, i32, i32) {
    %0 = arith.index_cast %arg0 : i32 to index
    %1 = memref.load %arg1[%0] : memref<2xi32, #tpu.memory_space<smem>>
    %c0_i32 = arith.constant 0 : i32
    %c0_i32_0 = arith.constant 0 : i32
    %c0_i32_1 = arith.constant 0 : i32
    return %1, %c0_i32, %c0_i32_0 : i32, i32, i32
  }
  func.func @transform_5(%arg0: i32, %arg1: memref<2xi32, #tpu.memory_space<smem>>, %arg2: memref<2xi32, #tpu.memory_space<smem>>) -> (i32, i32, i32) {
    %0 = arith.index_cast %arg0 : i32 to index
    %1 = memref.load %arg1[%0] : memref<2xi32, #tpu.memory_space<smem>>
    %c0_i32 = arith.constant 0 : i32
    %c0_i32_0 = arith.constant 0 : i32
    %c0_i32_1 = arith.constant 0 : i32
    return %1, %c0_i32, %c0_i32_0 : i32, i32, i32
  }
  func.func @transform_6(%arg0: i32, %arg1: memref<2xi32, #tpu.memory_space<smem>>, %arg2: memref<2xi32, #tpu.memory_space<smem>>) -> (i32, i32, i32) {
    %0 = arith.index_cast %arg0 : i32 to index
    %1 = memref.load %arg1[%0] : memref<2xi32, #tpu.memory_space<smem>>
    %c0_i32 = arith.constant 0 : i32
    %c0_i32_0 = arith.constant 0 : i32
    %c0_i32_1 = arith.constant 0 : i32
    return %1, %c0_i32, %c0_i32_0 : i32, i32, i32
  }
  func.func @transform_7(%arg0: i32, %arg1: memref<2xi32, #tpu.memory_space<smem>>, %arg2: memref<2xi32, #tpu.memory_space<smem>>) -> (i32, i32, i32) {
    %0 = arith.index_cast %arg0 : i32 to index
    %1 = memref.load %arg1[%0] : memref<2xi32, #tpu.memory_space<smem>>
    %2 = arith.index_cast %arg0 : i32 to index
    %3 = memref.load %arg2[%2] : memref<2xi32, #tpu.memory_space<smem>>
    %c0_i32 = arith.constant 0 : i32
    %c0_i32_0 = arith.constant 0 : i32
    return %1, %3, %c0_i32 : i32, i32, i32
  }
}

</mosaic_0001>

<bundles_post_ra>
// kernel: tpu_custom_call.1
= control target key start
LH: loop header
LB: loop body
LE: loop exit
PB: predicated region body
PF: predicated region fallthrough
CT: control target
= control target key end

     0   :  { %s2364_s0 = inlined_call_operand.hbm [shape: s32[2], index: 0, kind: input, shape index: {}]   ;;  %s2365_s2 = inlined_call_operand.hbm [shape: bf16[2,16,128], index: 2, kind: input, shape index: {}]   ;;  %s2366_s3 = inlined_call_operand.hbm [shape: bf16[2,128,128], index: 3, kind: input, shape index: {}]   ;;  %s2367_s4 = inlined_call_operand.vmem [shape: f32[2,1,128], index: 4, kind: input, shape index: {}]   ;;  %s2368_s5 = inlined_call_operand.hbm [shape: bf16[2,128,128], index: 5, kind: input, shape index: {}]   ;;  %s2369_s6 = inlined_call_operand.vmem [shape: f32[2,1,128], index: 6, kind: input, shape index: {}]   ;;  %s2370_s7 = inlined_call_operand.hbm [shape: bf16[2,128,128], index: 7, kind: input, shape index: {}]   ;;  %s2371_s8 = inlined_call_operand.vmem [shape: f32[2,1,128], index: 8, kind: input, shape index: {}]   ;;  %s2372_s9 = inlined_call_operand.hbm [shape: f32[2,16,128], index: 9, kind: output, shape index: {}]   ;;  %s2373_s1 = inlined_call_operand.vmem [shape: s32[2], index: 1, kind: input, shape index: {}]  }
   0x1   :  { %2410 = sst [smem:[#allocation49_spill]] %s2365_s2  ;;  %s1401_s11 = scalar_lea.hbm %s2364_s0, 16 }
   0x2   :  { %2411 = sst [smem:[#allocation50_spill]] %s2366_s3  ;;  %p1402_p0 = scmp.ne.s32.totalorder %s2364_s0, %s1401_s11 }
   0x3   :  { %2412 = sst [smem:[#allocation51_spill]] %s2367_s4  ;;  %p1405_p1 = scmp.lt.u32.totalorder %s1401_s11, %s2364_s0 }
   0x4   :  { %2413 = sst [smem:[#allocation52_spill]] %s2368_s5 }
   0x5   :  { %2414 = sst [smem:[#allocation53_spill]] %s2369_s6  ;;  %p1407_p2 = pnand %p1405_p1, %p1402_p0 }
   0x6   :  { %2415 = sst [smem:[#allocation54_spill]] %s2370_s7 }
   0x7   :  { %2416 = sst [smem:[#allocation55_spill]] %s2371_s8 }
   0x8   :  { %2417 = sst [smem:[#allocation56_spill]] %s2372_s9 }
   0x9   :  { %1410 = shalt.err (!%p1407_p2)  }
   0xa   :  { %s1721_s16 = smov [#allocation3]   ;;  %s16_s21 = sshll.u32 %s2373_s1, 4  ;;  %s17_s21 = int_to_ptr.vmem [resolvable:$true] %s16_s21 }
   0xb   :  { %15 = dma.hbm_to_smem %s2364_s0, 16, %s1721_s16, [#allocation2] }
   0xc   :  { %s1411_s22 = scalar_lea.vmem %s17_s21, 16  ;;  %p1416_p4 = scmp.lt.s32.totalorder %s17_s21, %s17_s21 }
   0xd   :  { %p1412_p3 = scmp.ne.s32.totalorder %s17_s21, %s1411_s22  ;;  %p1417_p5 = scmp.lt.s32.totalorder %s1411_s22, %s1411_s22 }
   0xf   :  { %p1418_p6 = por %p1417_p5, %p1416_p4 }
  0x11   :  { %p1419_p7 = pnand %p1418_p6, %p1412_p3 }
  0x13   :  { %1422 = shalt.err (!%p1419_p7)  }
  0x14   :  { %s1722_s23 = smov [#allocation4]  }
  0x15   :  { %19 = dma.vmem_to_smem %s17_s21, 16, %s1722_s23, [#allocation2] }
  0x16   :  { %1635 = dma.done.wait [#allocation2], 32 }
  0x17   :  { %1636 = vsyncadd [#allocation2], 4294967264 }
  0x18   :  { %21 = sfence }
  0x19   :  { %22 = vsyncpa [#allocation6], 0 }
  0x1a   :  { %24 = vsyncpa [#allocation6 + $0x1], 0 }
  0x1b   :  { %25 = vsyncpa [#allocation9], 0 }
  0x1c   :  { %26 = vsyncpa [#allocation12], 0 }
  0x1d   :  { %27 = vsyncpa [#allocation7], 0 }
  0x1e   :  { %29 = vsyncpa [#allocation7 + $0x1], 0  ;;  %s1799_s0 = smov 0   ;;  %s1801_s1 = smov 0  }
  0x1f   :  { %s1803_s24 = smov 0   ;;  %s1805_s25 = smov 0  }
  0x20   :  { %s1807_s26 = smov 0   ;;  %s1809_s27 = smov 0  }
  0x21   :  { %s1811_s28 = smov 0   ;;  %s1813_s29 = smov 0  }
  0x22   :  { %s1815_s30 = smov 0   ;;  %s1817_s10 = smov 0  }
  0x23   :  { %s1819_s11 = smov 0   ;;  %s1821_s12 = smov 0  }
  0x24   :  { %s1823_s13 = smov 0   ;;  %s1825_s14 = smov 0  }
  0x25   :  { %s1827_s15 = smov 0   ;;  %s1829_s16 = smov 0  }
  0x26 LB: > { %2418 = sst [smem:[#allocation32_spill]] %s1667_s24  ;;  %s1878_s17 = sadd.s32 4294967295, %s1719_s16   ;;  %s1719_s16 = sphi %s1829_s16, %s2489_s16   ;;  %s1715_s15 = sphi %s1827_s15, %s2503_s15   ;;  %s1711_s14 = sphi %s1825_s14, %s2502_s14   ;;  %s1707_s13 = sphi %s1823_s13, %s2501_s13   ;;  %s1703_s12 = sphi %s1821_s12, %s2500_s12   ;;  %s1699_s11 = sphi %s1819_s11, %s2499_s11   ;;  %s1695_s10 = sphi %s1817_s10, %s2498_s10   ;;  %s1691_s30 = sphi %s1815_s30, %s2497_s30   ;;  %s1687_s29 = sphi %s1813_s29, %s2507_s29   ;;  %s1683_s28 = sphi %s1811_s28, %s2495_s28   ;;  %s1679_s27 = sphi %s1809_s27, %s2494_s27   ;;  %s1675_s26 = sphi %s1807_s26, %s2493_s26   ;;  %s1671_s25 = sphi %s1805_s25, %s2492_s25   ;;  %s1667_s24 = sphi %s1803_s24, %s2491_s24   ;;  %s1663_s1 = sphi %s1801_s1, %s2506_s1   ;;  %s1659_s0 = sphi %s1799_s0, %s2504_s0  }
  0x27   : > { %2419 = sst [smem:[#allocation33_spill]] %s1671_s25  ;;  %s1882_s19 = sadd.s32 1, %s1719_s16  }
  0x28   : > { %2420 = sst [smem:[#allocation34_spill]] %s1675_s26  ;;  %p2381_p8 = scmp.eq.s32.totalorder %s1878_s17, 0 }
  0x29   : > { %2421 = sst [smem:[#allocation35_spill]] %s1679_s27  ;;  %s76_s22 = sadd.s32 1, %s1703_s12 }
  0x2a   : > { %2422 = sst [smem:[#allocation36_spill]] %s1687_s29  ;;  %p89_p9 = scmp.ne.s32.totalorder %s1699_s11, %s1695_s10 }
  0x2b   : > { %2423 = sst [smem:[#allocation37_spill]] %s1691_s30  ;;  %s132_s18 = sadd.s32 1, %s1691_s30 }
  0x2c   : > { %2424 = sst [smem:[#allocation38_spill]] %s1699_s11  ;;  %p1893_p10 = por %p89_p9, %p2381_p8 }
  0x2d   : > { %2425 = sst [smem:[#allocation39_spill]] %s1703_s12  ;;  %s188_s2 = sadd.s32 1, %s1679_s27 }
  0x2e   : > { %2426 = sst [smem:[#allocation40_spill]] %s1707_s13  ;;  %p258_p0 = scmp.ne.s32.totalorder %s1667_s24, %s1663_s1 }
  0x2f   : > { %2427 = sst [smem:[#allocation41_spill]] %s1711_s14  ;;  %p259_p2 = scmp.eq.s32.totalorder %s1878_s17, 1 }
  0x30   : > { %2428 = sst [smem:[#allocation42_spill]] %s1715_s15  ;;  %p264_p3 = scmp.ne.s32.totalorder %s1663_s1, %s1659_s0 }
  0x31   : > { %2429 = sst [smem:[#allocation43_spill]] %s1882_s19  ;;  %p1925_p5 = por %p259_p2, %p258_p0 }
  0x32   : > { %s71_s20 = sld [smem:[#allocation3 + %s1719_s16]]  ;;  %p1018_p7 = scmp.ge.s32.totalorder %s1719_s16, 1 }
  0x33   : > { %s72_s21 = sld [smem:[#allocation3 + %s1882_s19]]  ;;  %p272_p9 = scmp.lt.s32.totalorder %s1719_s16, 3 }
  0x34   : > { %s127_s23 = sld [smem:[#allocation3 + %s1719_s16]] }
  0x35   : > { %s128_s9 = sld [smem:[#allocation3 + %s1882_s19]] }
  0x36   : > { %s2430_s8 = scalar_select %p1893_p10, 1, 0 }
  0x37   : > { %s183_s6 = sld [smem:[#allocation3 + %s1719_s16]] }
  0x38   : > { %s184_s4 = sld [smem:[#allocation3 + %s1882_s19]] }
  0x39   : > { %s239_s7 = sld [smem:[#allocation3 + %s1719_s16]]  ;;  %s73_s13 = ssub.s32 %s71_s20, %s72_s21 }
  0x3a   : > { %s240_s14 = sld [smem:[#allocation4 + %s1719_s16]]  ;;  %p74_p11 = scmp.eq.s32.totalorder %s73_s13, 0 }
  0x3b   : > { %s241_s10 = sld [smem:[#allocation3 + %s1882_s19]]  ;;  %s129_s11 = ssub.s32 %s127_s23, %s128_s9 }
  0x3c   : > { %s242_s15 = sld [smem:[#allocation4 + %s1882_s19]]  ;;  %p130_p12 = scmp.eq.s32.totalorder %s129_s11, 0 }
  0x3d   : > { %s1906_s5 = scalar_select %p74_p11, %s1703_s12, %s76_s22  }
  0x3e   : > { %s185_s26 = ssub.s32 %s183_s6, %s184_s4  ;;  %s248_s20 = sadd.s32 1, %s1667_s24 }
  0x3f   : > { %2431 = sst [smem:[#allocation44_spill]] %s1906_s5  ;;  %p186_p13 = scmp.eq.s32.totalorder %s185_s26, 0 }
  0x40   : > { %s1910_s21 = scalar_select %p130_p12, %s1691_s30, %s132_s18  }
  0x41   : > { %s1913_s13 = scalar_select %p186_p13, %s1679_s27, %s188_s2  }
  0x42   : > { %2432 = sst [smem:[#allocation45_spill]] %s1910_s21  ;;  %s243_s25 = ssub.s32 %s239_s7, %s241_s10 }
  0x43   : > { %2433 = sst [smem:[#allocation46_spill]] %s1913_s13  ;;  %s244_s9 = ssub.s32 %s240_s14, %s242_s15 }
  0x44   : > { %s245_s23 = sor.u32 %s244_s9, %s243_s25  ;;  %s2434_s4 = sadd.s32 4294967294, %s1719_s16  }
  0x45   : > { %p246_p1 = scmp.eq.s32.totalorder %s245_s23, 0  ;;  %p265_p4 = scmp.eq.s32.totalorder %s2434_s4, 1 }
  0x46   : > { %s2436_s26 = scalar_select %p1925_p5, 1, 0 }
  0x47   : > { %s1923_s6 = scalar_select %p246_p1, %s1667_s24, %s248_s20  }
  0x48   : > { %p1929_p6 = por %p265_p4, %p264_p3  ;;  %p1937_p11 = pnand %p1018_p7, %p272_p9 }
  0x49   : > { %2435 = sst [smem:[#allocation47_spill]] %s1923_s6  ;;  %s1723_s14 = smov [#allocation8]  }
  0x4a   : > { %s2437_s2 = scalar_select %p1929_p6, 1, 0 }
  0x4b   : > { %s1161_s7 = scalar_select %p1893_p10, [#allocation3], [#allocation14] }
  0x4c   : > { %s2438_s25 = scalar_select %p1937_p11, 1, 0 }
  0x4d   : > { %s1162_s11 = scalar_select %p1893_p10, %s1878_s17, 0 }
  0x4e   : > { %p2382_p12 = pneg %p1937_p11  ;;  %s288_s15 = sshll.u32 %s1723_s14, 4  ;;  %s1959_s15 = int_to_ptr.vmem [resolvable:$true] %s288_s15 }
  0x4f   : > { %s2509_s7 = smov (%p1937_p11, %s1161_s7), [#allocation21]  ;;  %s2511_s11 = smov (%p1937_p11, %s1162_s11), 0 }
  0x50   : > { %p1955_p13 = pnand %p2382_p12, %p1893_p10  ;;  %s281_s22 = sld [smem:[%s2509_s7 + %s2511_s11]] }
  0x51   : > { %p145_p1 = scmp.ne.s32.totalorder %s1687_s29, %s1683_s28  ;;  %s1724_s20 = smov [#allocation10]  }
  0x52   : > { %s1964_s9 = sshll.u32 %s1724_s20, 4  ;;  %s2440_s3 = sld [smem:[#allocation50_spill]]  ;;  %s2025_s9 = int_to_ptr.vmem [resolvable:$true] %s1964_s9 }
  0x53   : > { %p1973_p2 = por %p145_p1, %p2381_p8  ;;  %p1425_p4 = pneg %p1955_p13 }
  0x55   : > { %s2441_s7 = scalar_select %p1973_p2, 1, 0 }
  0x56   : > { %s1071_s10 = sshll.u32 %s281_s22, 10 }
  0x58   : > { %s1969_s14 = scalar_lea.hbm %s2440_s3, %s1071_s10  ;;  %s1428_s10 = scalar_lea.hbm %s2440_s3, 2048 }
  0x59   : > { %s1423_s11 = scalar_lea.hbm %s1969_s14, 1024  ;;  %p1429_p0 = scmp.lt.u32.totalorder %s1969_s14, %s2440_s3 }
  0x5a   : > { %p1424_p3 = scmp.ne.s32.totalorder %s1969_s14, %s1423_s11  ;;  %p1430_p1 = scmp.lt.u32.totalorder %s1428_s10, %s1423_s11 }
  0x5b   : > { %p1432_p12 = scmp.lt.u32.totalorder %s1423_s11, %s1969_s14 }
  0x5c   : > { %p1426_p7 = pnand %p1425_p4, %p1424_p3  ;;  %p1431_p8 = por %p1430_p1, %p1429_p0 }
  0x5e   : > { %p1427_p9 = pneg %p1426_p7  ;;  %p1433_p6 = por %p1432_p12, %p1431_p8 }
  0x60   : > { %p1434_p5 = pnand %p1433_p6, %p1427_p9 }
  0x62   : > { %1437 = shalt.err (!%p1434_p5)
}
  0x63   : > { %s1438_s4 = scalar_lea.vmem %s1959_s15, 1024  ;;  %p1446_p11 = scmp.lt.s32.totalorder %s1959_s15, %s1959_s15 }
  0x64   : > { %p1439_p3 = scmp.ne.s32.totalorder %s1959_s15, %s1438_s4  ;;  %p1447_p2 = scmp.lt.s32.totalorder %s1438_s4, %s1438_s4 }
  0x66   : > { %p1441_p7 = pnand %p1439_p3, %p1425_p4  ;;  %p1448_p0 = por %p1447_p2, %p1446_p11 }
  0x68   : > { %p1442_p10 = pneg %p1441_p7 }
  0x6a   : > { %p1449_p1 = pnand %p1448_p0, %p1442_p10 }
  0x6c   : > { %1452 = shalt.err (!%p1449_p1)
}
  0x6d   : > { %s2390_s11 = smov 64   ;;  %s2442_s28 = sld [smem:[#allocation33_spill]] }
  0x6e   : > { %s2443_s22 = sld [smem:[#allocation34_spill]]  ;;  %s2392_s10 = smov 4  }
  0x6f   : > { %1190 = dma.hbm_to_vmem [thread:$0]  (!%p1955_p13), %s1969_s14, 1024, %s1959_s15, [#allocation9], %s2390_s11, %s2390_s11, %s2392_s10  }
  0x70   : > { %p2444_p8 = scmp.ne.s32.totalorder %s2441_s7, 0  ;;  %p2445_p10 = scmp.ne.s32.totalorder %s2438_s25, 0 }
  0x71   : > { %s1727_s15 = smov [#allocation11]   ;;  %p2448_p12 = scmp.eq.s32.totalorder %s1878_s17, 0 }
  0x72   : > { %s1164_s20 = scalar_select %p2444_p8, [#allocation3], [#allocation15] }
  0x73   : > { %s1165_s23 = scalar_select %p2444_p8, %s1878_s17, 0 }
  0x74   : > { %s2513_s20 = smov (%p2445_p10, %s1164_s20), [#allocation22]  ;;  %p2446_p5 = pneg %p2445_p10 }
  0x75   : > { %s2515_s23 = smov (%p2445_p10, %s1165_s23), 0  ;;  %p201_p11 = scmp.ne.s32.totalorder %s2443_s22, %s2442_s28 }
  0x76   : > { %p2020_p6 = pnand %p2446_p5, %p2444_p8  ;;  %s306_s18 = sld [smem:[%s2513_s20 + %s2515_s23]] }
  0x77   : > { %s2029_s14 = sshll.u32 %s1727_s15, 4  ;;  %p2033_p13 = por %p201_p11, %p2448_p12  ;;  %s2092_s14 = int_to_ptr.vmem [resolvable:$true] %s2029_s14 }
  0x78   : > { %s2450_s12 = sld [smem:[#allocation52_spill]]  ;;  %p2452_p2 = pmov %p2446_p5 }
  0x79   : > { %s2449_s11 = scalar_select %p2033_p13, 1, 0 }
  0x7a   : > { %p2045_p4 = pnand %p2452_p2, %p2033_p13  ;;  %p1455_p3 = pneg %p2020_p6 }
  0x7c   : > { %s1072_s10 = sshll.u32 %s306_s18, 10 }
  0x7d   : > { %s2453_s20 = scalar_select %p2045_p4, 1, 0 }
  0x7e   : > { %s2451_s21 = smov %s2450_s12  ;;  %s312_s30 = scalar_lea.hbm %s2450_s12, %s1072_s10 }
  0x7f   : > { %s1453_s28 = scalar_lea.hbm %s312_s30, 1024  ;;  %s1458_s3 = scalar_lea.hbm %s2451_s21, 2048 }
  0x80   : > { %p1454_p9 = scmp.ne.s32.totalorder %s312_s30, %s1453_s28  ;;  %p1459_p1 = scmp.lt.u32.totalorder %s312_s30, %s2451_s21 }
  0x81   : > { %p1460_p8 = scmp.lt.u32.totalorder %s1458_s3, %s1453_s28  ;;  %p1462_p11 = scmp.lt.u32.totalorder %s1453_s28, %s312_s30 }
  0x82   : > { %p1456_p7 = pnand %p1455_p3, %p1454_p9 }
  0x83   : > { %p1461_p5 = por %p1460_p8, %p1459_p1 }
  0x84   : > { %p1457_p0 = pneg %p1456_p7 }
  0x85   : > { %p1463_p12 = por %p1462_p11, %p1461_p5 }
  0x87   : > { %p1464_p2 = pnand %p1463_p12, %p1457_p0 }
  0x89   : > { %1467 = shalt.err (!%p1464_p2)
}
  0x8a   : > { %s1468_s10 = scalar_lea.vmem %s2025_s9, 1024  ;;  %p1476_p10 = scmp.lt.s32.totalorder %s2025_s9, %s2025_s9 }
  0x8b   : > { %p1469_p9 = scmp.ne.s32.totalorder %s2025_s9, %s1468_s10  ;;  %p1477_p13 = scmp.lt.s32.totalorder %s1468_s10, %s1468_s10 }
  0x8d   : > { %p1471_p7 = pnand %p1469_p9, %p1455_p3  ;;  %p1478_p1 = por %p1477_p13, %p1476_p10 }
  0x8f   : > { %p1472_p4 = pneg %p1471_p7 }
  0x91   : > { %p1479_p8 = pnand %p1478_p1, %p1472_p4 }
  0x93   : > { %1482 = shalt.err (!%p1479_p8)
}
  0x94   : > { %s2454_s18 = smov 4   ;;  %s2455_s15 = smov 64  }
  0x95   : > { %s2456_s28 = sld [smem:[#allocation42_spill]]  ;;  %s2457_s22 = sld [smem:[#allocation41_spill]] }
  0x96   : > { %s2458_s23 = sld [smem:[#allocation40_spill]]  ;;  %p2459_p10 = scmp.ne.s32.totalorder %s2449_s11, 0 }
  0x97   : > { %1195 = dma.hbm_to_vmem [thread:$0]  (!%p2020_p6), %s312_s30, 1024, %s2025_s9, [#allocation9], %s2455_s15, %s2455_s15, %s2454_s18  }
  0x98   : > { %s1167_s4 = scalar_select %p2459_p10, [#allocation3], [#allocation16] }
  0x99   : > { %s1168_s3 = scalar_select %p2459_p10, %s1878_s17, 0 }
  0x9a   : > { %p2460_p13 = scmp.ne.s32.totalorder %s2438_s25, 0  ;;  %s2083_s12 = sld [smem:[#allocation3 + %s1719_s16]] }
  0x9b   : > { %s2086_s10 = sld [smem:[#allocation4 + %s1719_s16]]  ;;  %p2462_p5 = scmp.eq.s32.totalorder %s1878_s17, 0 }
  0x9c   : > { %s2517_s4 = smov (%p2460_p13, %s1167_s4), [#allocation23]  ;;  %s2519_s3 = smov (%p2460_p13, %s1168_s3), 0 }
  0x9d   : > { %s331_s5 = sld [smem:[%s2517_s4 + %s2519_s3]]  ;;  %p61_p3 = scmp.ne.s32.totalorder %s2457_s22, %s2458_s23 }
  0x9e   : > { %s2089_s21 = sld [smem:[#allocation3 + %s1882_s19]]  ;;  %p2464_p2 = scmp.ne.s32.totalorder %s2453_s20, 0 }
  0x9f   : > { %s2095_s30 = sld [smem:[#allocation4 + %s1882_s19]]  ;;  %p2109_p11 = por %p2462_p5, %p61_p3 }
  0xa0   : > { %s2461_s3 = sld [smem:[#allocation54_spill]]  ;;  %p1485_p9 = pneg %p2464_p2 }
  0xa1   : > { %s2463_s6 = scalar_select %p2109_p11, 1, 0 }
  0xa3   : > { %s1073_s29 = sshll.u32 %s331_s5, 10 }
  0xa6   : > { %s337_s27 = scalar_lea.hbm %s2461_s3, %s1073_s29  ;;  %s1488_s9 = scalar_lea.hbm %s2461_s3, 2048 }
  0xa7   : > { %s1483_s24 = scalar_lea.hbm %s337_s27, 1024  ;;  %p1489_p8 = scmp.lt.u32.totalorder %s337_s27, %s2461_s3 }
  0xa8   : > { %p1484_p12 = scmp.ne.s32.totalorder %s337_s27, %s1483_s24  ;;  %p1490_p10 = scmp.lt.u32.totalorder %s1488_s9, %s1483_s24 }
  0xa9   : > { %p1492_p5 = scmp.lt.u32.totalorder %s1483_s24, %s337_s27 }
  0xaa   : > { %p1486_p7 = pnand %p1485_p9, %p1484_p12  ;;  %p1491_p3 = por %p1490_p10, %p1489_p8 }
  0xac   : > { %p1487_p1 = pneg %p1486_p7  ;;  %p1493_p0 = por %p1492_p5, %p1491_p3 }
  0xae   : > { %p1494_p4 = pnand %p1493_p0, %p1487_p1 }
  0xb0   : > { %1497 = shalt.err (!%p1494_p4)
}
  0xb1   : > { %s1498_s29 = scalar_lea.vmem %s2092_s14, 1024  ;;  %p1506_p11 = scmp.lt.s32.totalorder %s2092_s14, %s2092_s14 }
  0xb2   : > { %p1499_p12 = scmp.ne.s32.totalorder %s2092_s14, %s1498_s29  ;;  %p1507_p13 = scmp.lt.s32.totalorder %s1498_s29, %s1498_s29 }
  0xb4   : > { %p1501_p7 = pnand %p1499_p12, %p1485_p9  ;;  %p1508_p8 = por %p1507_p13, %p1506_p11 }
  0xb6   : > { %p1502_p6 = pneg %p1501_p7 }
  0xb8   : > { %p1509_p10 = pnand %p1508_p8, %p1502_p6 }
  0xba   : > { %1512 = shalt.err (!%p1509_p10)
}
  0xbb   : > { %1200 = dma.hbm_to_vmem [thread:$0]  (!%p2464_p2), %s337_s27, 1024, %s2092_s14, [#allocation12], %s2455_s15, %s2455_s15, %s2454_s18  }
  0xbc   : > { %s43_s24 = ssub.s32 %s2083_s12, %s2089_s21  ;;  %s44_s19 = ssub.s32 %s2086_s10, %s2095_s30 }
  0xbd   : > { %s45_s20 = sor.u32 %s44_s19, %s43_s24  ;;  %p2465_p13 = scmp.ne.s32.totalorder %s2456_s28, %s2457_s22 }
  0xbe   : > { %p2466_p6 = scmp.eq.s32.totalorder %s1719_s16, 0  ;;  %p46_p0 = scmp.eq.s32.totalorder %s45_s20, 0 }
  0xbf   : > { %p2467_p11 = scmp.lt.s32.totalorder %s1719_s16, 2  ;;  %s2469_s4 = sadd.s32 1, %s2456_s28 }
  0xc0   : > { %p57_p4 = por %p2466_p6, %p2465_p13  ;;  %s360_s5 = sand.u32 1, %s2456_s28  }
  0xc1   : > { %s2155_s23 = scalar_select %p46_p0, %s2456_s28, %s2469_s4  }
  0xc2   : > { %p2148_p9 = pnand %p2467_p11, %p57_p4  ;;  %p2471_p2 = pmov %p2467_p11 }
  0xc3   : > { %2470 = sst [smem:[#allocation48_spill]] %s2155_s23  ;;  %s1026_s21 = sshll.u32 %s360_s5, 3 }
  0xc4   : > { %s1170_s13 = scalar_select %p57_p4, [#allocation3], [#allocation17] }
  0xc5   : > { %s1171_s29 = scalar_select %p57_p4, %s1719_s16, 0 }
  0xc6   : > { %s2521_s13 = smov (!%p2471_p2, %s1170_s13), [#allocation24]  ;;  %p2472_p1 = pmov %p2471_p2 }
  0xc7   : > { %s1172_s27 = scalar_select %p57_p4, [#allocation4], [#allocation18] }
  0xc8   : > { %s2523_s29 = smov (!%p2472_p1, %s1171_s29), 0  ;;  %p2473_p3 = pmov %p2472_p1 }
  0xc9   : > { %s365_s14 = sld [smem:[%s2521_s13 + %s2523_s29]]  ;;  %s364_s10 = scalar_lea.vmem [#allocation5], %s1026_s21 }
  0xca   : > { %s2525_s27 = smov (!%p2473_p3, %s1172_s27), [#allocation25]  ;;  %s375_s30 = sshll.u32 %s364_s10, 4  ;;  %s2165_s30 = int_to_ptr.vmem [resolvable:$true] %s375_s30 }
  0xcb   : > { %s366_s22 = sld [smem:[%s2525_s27 + %s2523_s29]]  ;;  %s2172_s13 = scalar_lea.sflag [#allocation6], %s360_s5 }
  0xcc   : > { %s2474_s3 = sld [smem:[#allocation49_spill]]  ;;  %p1515_p12 = pneg %p2148_p9 }
  0xcf   : > { %s1028_s12 = sshll.u32 %s365_s14, 1 }
  0xd1   : > { %s1027_s24 = sshll.u32 %s366_s22, 1 }
  0xd2   : > { %s372_s19 = sadd.s32 %s1028_s12, %s1027_s24  ;;  %s1518_s14 = scalar_lea.hbm %s2474_s3, 256 }
  0xd3   : > { %s1029_s28 = sshll.u32 %s372_s19, 6 }
  0xd4   : > { %s2170_s23 = scalar_lea.hbm %s2474_s3, %s1029_s28 }
  0xd5   : > { %s1513_s29 = scalar_lea.hbm %s2170_s23, 128  ;;  %p1519_p10 = scmp.lt.u32.totalorder %s2170_s23, %s2474_s3 }
  0xd6   : > { %p1514_p5 = scmp.ne.s32.totalorder %s2170_s23, %s1513_s29  ;;  %p1520_p13 = scmp.lt.u32.totalorder %s1518_s14, %s1513_s29 }
  0xd7   : > { %p1522_p4 = scmp.lt.u32.totalorder %s1513_s29, %s2170_s23 }
  0xd8   : > { %p1516_p7 = pnand %p1515_p12, %p1514_p5  ;;  %p1521_p6 = por %p1520_p13, %p1519_p10 }
  0xda   : > { %p1517_p8 = pneg %p1516_p7  ;;  %p1523_p0 = por %p1522_p4, %p1521_p6 }
  0xdc   : > { %p1524_p11 = pnand %p1523_p0, %p1517_p8 }
  0xde   : > { %1527 = shalt.err (!%p1524_p11)
}
  0xdf   : > { %s1528_s5 = scalar_lea.vmem %s2165_s30, 128  ;;  %s1728_s10 = smov [#allocation5]  }
  0xe0   : > { %p1529_p2 = scmp.ne.s32.totalorder %s2165_s30, %s1528_s5  ;;  %s1533_s24 = sshll.u32 %s1728_s10, 4  ;;  %s1534_s24 = int_to_ptr.vmem [resolvable:$false] %s1533_s24 }
  0xe1   : > { %s1535_s19 = scalar_lea.vmem %s1534_s24, 256  ;;  %p1536_p5 = scmp.lt.s32.totalorder %s2165_s30, %s1534_s24 }
  0xe2   : > { %p1531_p1 = pnand %p1529_p2, %p1515_p12  ;;  %p1537_p7 = scmp.lt.s32.totalorder %s1535_s19, %s1528_s5 }
  0xe4   : > { %p1532_p3 = pneg %p1531_p1  ;;  %p1538_p10 = por %p1537_p7, %p1536_p5 }
  0xe6   : > { %p1539_p13 = pnand %p1538_p10, %p1532_p3 }
  0xe8   : > { %1542 = shalt.err (!%p1539_p13)
}
  0xe9   : > { %1208 = dma.hbm_to_vmem [thread:$0]  (!%p2148_p9), %s2170_s23, 128, %s2165_s30, %s2172_s13, %s2455_s15, %s2455_s15, %s2454_s18  }
  0xea   : > { %p2475_p12 = scmp.ne.s32.totalorder %s2438_s25, 0 }
  0xeb   : > { %s2476_s28 = sld [smem:[#allocation41_spill]] (!%p2475_p12)  ;;  %p2477_p8 = scmp.ne.s32.totalorder (!%p2475_p12), %s2463_s6, 0 }
  0xec   : > { %387 = sbr.rel (%p2475_p12) target bundleno = 1011 (0x3f3), region = 48 }
  0xf1   : > { %s389_s20 = sand.u32 (!%p2475_p12), 1, %s2476_s28  }
  0xf2   : > { %s2206_s4 = sshll.u32 (!%p2475_p12), %s389_s20, 3  ;;  %s390_s29 = scalar_lea.sflag (!%p2475_p12), [#allocation6], %s389_s20 }
  0xf3   : > { %s393_s27 = scalar_lea.vmem [#allocation5], %s2206_s4 }
  0xf4   : > { %1638 = dma.done.wait (%p2477_p8), %s390_s29, 128  }
  0xf5   : > { %1640 = vsyncadd (%p2477_p8), %s390_s29, 4294967168  ;;  %p2478_p6 = scmp.ne.s32.totalorder %s2430_s8, 0 }
  0xf7   : > { %1642 = dma.done.wait (%p2478_p6), [#allocation9], 1024  }
  0xf8   : > { %1644 = vsyncadd (%p2478_p6), [#allocation9], 4294966272  ;;  %p2479_p9 = scmp.ne.s32.totalorder %s2441_s7, 0 }
  0xfa   : > { %1646 = dma.done.wait (%p2479_p9), [#allocation9], 1024  }
  0xfb   : > { %1648 = vsyncadd (%p2479_p9), [#allocation9], 4294966272  ;;  %p2480_p4 = scmp.ne.s32.totalorder %s2449_s11, 0 }
  0xfd   : > { %1650 = dma.done.wait (%p2480_p4), [#allocation12], 1024  }
  0xfe   : > { %1652 = vsyncadd (%p2480_p4), [#allocation12], 4294966272  ;;  %v1729_v0 = vmov 0.0   ;;  %vm1730_vm0 = vmmov 0   ;;  %v1360_v1 = vld [vmem:[#allocation8] sm:$0xff]   ;;  %v1361_v2 = vld [vmem:[#allocation8 + $0x8] sm:$0xff]  }
  0xff   : > { %1101 = vmatprep.subr.bf16.mxu0 %v1729_v0  ;;  %1117 = vmatprep.mubr.msk.bf16.mxu0 %vm1730_vm0, %v1729_v0  ;;  %v1362_v3 = vld [vmem:[#allocation8 + $0x10] sm:$0xff]   ;;  %v1363_v4 = vld [vmem:[#allocation8 + $0x18] sm:$0xff]   ;;  %v1364_v5 = vld [vmem:[#allocation8 + $0x20] sm:$0xff]   ;;  %s452_s8 = sld [smem:[#allocation3 + %s1878_s17]]  ;;  %p2483_p2 = scmp.ne.s32.totalorder %s2436_s26, 0 }
 0x100   : > { %1121 = vmatprep.subr.bf16.mxu1 %v1729_v0  ;;  %1137 = vmatprep.mubr.msk.bf16.mxu1 %vm1730_vm0, %v1729_v0  ;;  %v1365_v6 = vld [vmem:[#allocation8 + $0x28] sm:$0xff]   ;;  %v1366_v7 = vld [vmem:[#allocation8 + $0x30] sm:$0xff]   ;;  %v1367_v8 = vld [vmem:[#allocation8 + $0x38] sm:$0xff]   ;;  %s2481_s7 = sld [smem:[#allocation51_spill]]  ;;  %s2482_s23 = sld [smem:[#allocation53_spill]] }
 0x101   : > { %1102 = vmatpush3.bf16.msra.mxu0 %v1360_v1  ;;  %v1368_v9 = vld [vmem:[%s393_s27] sm:$0xff]   ;;  %v1369_v10 = vld [vmem:[#allocation10] sm:$0xff]   ;;  %v1370_v11 = vld [vmem:[#allocation10 + $0x8] sm:$0xff]   ;;  %s458_s18 = sld [smem:[#allocation3 + %s1878_s17]]  ;;  %s445_s5 = sand.u32 1, %s1663_s1  }
 0x102   : > { %1103 = vmatprep.subr.bf16.mxu0 %v1729_v0  ;;  %1122 = vmatpush3.bf16.msra.mxu1 %v1369_v10  ;;  %v1371_v12 = vld [vmem:[#allocation10 + $0x10] sm:$0xff]   ;;  %v1372_v13 = vld [vmem:[#allocation10 + $0x18] sm:$0xff]   ;;  %v1373_v14 = vld [vmem:[#allocation10 + $0x20] sm:$0xff]   ;;  %s464_s13 = sld [smem:[#allocation3 + %s1878_s17]]  ;;  %s2531_s17 = smov (!%p2483_p2, %s1878_s17), 0 }
 0x103   : > { %1123 = vmatprep.subr.bf16.mxu1 %v1729_v0  ;;  %v1374_v15 = vld [vmem:[#allocation10 + $0x28] sm:$0xff]   ;;  %v1375_v16 = vld [vmem:[#allocation10 + $0x30] sm:$0xff]   ;;  %v1376_v17 = vld [vmem:[#allocation10 + $0x38] sm:$0xff]   ;;  %s1179_s21 = scalar_select %p2483_p2, [#allocation3], [#allocation19] }
 0x104   : > { %v1377_v36 = vld [vmem:[#allocation11] sm:$0xff]   ;;  %v1378_v37 = vld [vmem:[#allocation11 + $0x8] sm:$0xff]   ;;  %v1379_v38 = vld [vmem:[#allocation11 + $0x10] sm:$0xff]   ;;  %s1181_s14 = scalar_select %p2483_p2, [#allocation4], [#allocation20] }
 0x105   : > { %1104 = vmatpush3.bf16.msra.mxu0 %v1361_v2  ;;  %p453_p0 = scmp.lt.s32.totalorder %s452_s8, 1  ;;  %v1380_v39 = vld [vmem:[#allocation11 + $0x18] sm:$0xff]   ;;  %v1381_v40 = vld [vmem:[#allocation11 + $0x20] sm:$0xff]   ;;  %v1382_v41 = vld [vmem:[#allocation11 + $0x28] sm:$0xff]   ;;  %s857_s22 = sld [smem:[%s1179_s21 + %s2531_s17]] }
 0x106   : > { %1105 = vmatprep.subr.bf16.mxu0 %v1729_v0  ;;  %1124 = vmatpush3.bf16.msra.mxu1 %v1370_v11  ;;  %v1383_v42 = vld [vmem:[#allocation11 + $0x30] sm:$0xff]   ;;  %v1384_v43 = vld [vmem:[#allocation11 + $0x38] sm:$0xff]   ;;  %s858_s12 = sld [smem:[%s1181_s14 + %s2531_s17]]  ;;  %s1032_s10 = sshll.u32 %s445_s5, 4 }
 0x107   : > { %1125 = vmatprep.subr.bf16.mxu1 %v1729_v0  ;;  %s2527_s8 = smov (!%p453_p0, %s452_s8), 1  ;;  %p459_p11 = scmp.lt.s32.totalorder %s458_s18, 1 }
 0x108   : > { %s455_s11 = scalar_lea.vmem %s2481_s7, %s2527_s8  ;;  %p465_p1 = scmp.lt.s32.totalorder %s464_s13, 1 }
 0x109   : > { %1106 = vmatpush3.bf16.msra.mxu0 %v1362_v3  ;;  %v1033_v18 = vld [vmem:[%s455_s11] ss:$0 sm:$0xff]  ;;  %s2529_s18 = smov (!%p459_p11, %s458_s18), 1  ;;  %s2484_s4 = sld [smem:[#allocation55_spill]] }
 0x10a   : > { %1107 = vmatprep.subr.bf16.mxu0 %v1729_v0  ;;  %1126 = vmatpush3.bf16.msra.mxu1 %v1371_v12  ;;  %s461_s30 = scalar_lea.vmem %s2482_s23, %s2529_s18  ;;  %s2533_s13 = smov (!%p465_p1, %s464_s13), 1 }
 0x10b   : > { %1127 = vmatprep.subr.bf16.mxu1 %v1729_v0  ;;  %v1045_v44 = vld [vmem:[%s461_s30] ss:$0 sm:$0xff]  ;;  %s1067_s19 = sshll.u32 %s857_s22, 1  ;;  %s447_s8 = scalar_lea.vmem [#allocation13], %s1032_s10 }
 0x10c   : > { %s1066_s24 = sshll.u32 %s858_s12, 1  ;;  %s867_s6 = sshll.u32 %s447_s8, 4  ;;  %s2277_s6 = int_to_ptr.vmem [resolvable:$true] %s867_s6 }
 0x10d   : > { %1108 = vmatpush3.bf16.msra.mxu0 %v1363_v4  ;;  %s864_s27 = sadd.s32 %s1067_s19, %s1066_s24  ;;  %s2485_s11 = sld [smem:[#allocation56_spill]] }
 0x10e   : > { %1109 = vmatprep.subr.bf16.mxu0 %v1729_v0  ;;  %1128 = vmatpush3.bf16.msra.mxu1 %v1372_v13  ;;  %s1068_s25 = sshll.u32 %s864_s27, 7  ;;  %s2284_s9 = scalar_lea.sflag [#allocation7], %s445_s5 }
 0x10f   : > { %1129 = vmatprep.subr.bf16.mxu1 %v1729_v0  ;;  %s467_s29 = scalar_lea.vmem %s2484_s4, %s2533_s13  ;;  %s1543_s23 = scalar_lea.vmem %s2277_s6, 256 }
 0x110   : > { %v1056_v62 = vld [vmem:[%s467_s29] ss:$0 sm:$0xff]  ;;  %p1544_p3 = scmp.ne.s32.totalorder %s2277_s6, %s1543_s23  ;;  %s1731_s30 = smov [#allocation13]  }
 0x111   : > { %1110 = vmatpush3.bf16.msra.mxu0 %v1364_v5  ;;  %s1547_s13 = sshll.u32 %s1731_s30, 4  ;;  %s1548_s13 = int_to_ptr.vmem [resolvable:$false] %s1547_s13 }
 0x112   : > { %1111 = vmatprep.subr.bf16.mxu0 %v1729_v0  ;;  %1130 = vmatpush3.bf16.msra.mxu1 %v1373_v14  ;;  %p1545_p5 = pnand %p1544_p3, %p2483_p2  ;;  %s1549_s21 = scalar_lea.vmem %s1548_s13, 512 }
 0x113   : > { %1131 = vmatprep.subr.bf16.mxu1 %v1729_v0  ;;  %s2486_s18 = smov %s2485_s11  ;;  %s2282_s15 = scalar_lea.hbm %s2485_s11, %s1068_s25 }
 0x114   : > { %p1546_p7 = pneg %p1545_p5  ;;  %p1550_p10 = scmp.lt.s32.totalorder %s2277_s6, %s1548_s13 }
 0x115   : > { %1112 = vmatpush3.bf16.msra.mxu0 %v1365_v6  ;;  %p1551_p13 = scmp.lt.s32.totalorder %s1549_s21, %s1543_s23 }
 0x116   : > { %1113 = vmatprep.subr.bf16.mxu0 %v1729_v0  ;;  %1132 = vmatpush3.bf16.msra.mxu1 %v1374_v15 }
 0x117   : > { %1133 = vmatprep.subr.bf16.mxu1 %v1729_v0  ;;  %p1552_p12 = por %p1551_p13, %p1550_p10 }
 0x119   : > { %1114 = vmatpush3.bf16.msra.mxu0 %v1366_v7  ;;  %p1553_p8 = pnand %p1552_p12, %p1546_p7 }
 0x11a   : > { %1115 = vmatprep.subr.bf16.mxu0 %v1729_v0  ;;  %1134 = vmatpush3.bf16.msra.mxu1 %v1375_v16 }
 0x11b   : > { %1135 = vmatprep.subr.bf16.mxu1 %v1729_v0 }
 0x11d   : > { %1116 = vmatpush3.bf16.msra.mxu0 %v1367_v8 }
 0x11e   : > { %1141 = vmatprep.subr.bf16.mxu0 %v1729_v0  ;;  %1136 = vmatpush3.bf16.msra.mxu1 %v1376_v17 }
 0x120   : > { %1118 = vmatmul.mubr.bf16.vlgmr.msra.gmra.mrb[0].mxu0 %v1368_v9 }
 0x121   : > { %1157 = vmatprep.mubr.msk.bf16.mxu0 %vm1730_vm0, %v1729_v0  ;;  %1142 = vmatpush3.bf16.msra.mxu0 %v1377_v36 }
 0x122   : > { %1143 = vmatprep.subr.bf16.mxu0 %v1729_v0 }
 0x125   : > { %1144 = vmatpush3.bf16.msra.mxu0 %v1378_v37 }
 0x126   : > { %1145 = vmatprep.subr.bf16.mxu0 %v1729_v0 }
 0x129   : > { %1146 = vmatpush3.bf16.msra.mxu0 %v1379_v38 }
 0x12a   : > { %1147 = vmatprep.subr.bf16.mxu0 %v1729_v0 }
 0x12d   : > { %1148 = vmatpush3.bf16.msra.mxu0 %v1380_v39 }
 0x12e   : > { %1149 = vmatprep.subr.bf16.mxu0 %v1729_v0 }
 0x131   : > { %1150 = vmatpush3.bf16.msra.mxu0 %v1381_v40 }
 0x132   : > { %1151 = vmatprep.subr.bf16.mxu0 %v1729_v0 }
 0x135   : > { %1152 = vmatpush3.bf16.msra.mxu0 %v1382_v41 }
 0x136   : > { %1153 = vmatprep.subr.bf16.mxu0 %v1729_v0 }
 0x139   : > { %1154 = vmatpush3.bf16.msra.mxu0 %v1383_v42 }
 0x13a   : > { %1155 = vmatprep.subr.bf16.mxu0 %v1729_v0 }
 0x13d   : > { %1156 = vmatpush3.bf16.msra.mxu0 %v1384_v43 }
 0x1f3   : > { %v586_v19 = vpop.f32.mrb[0].mxu0 }
 0x1f4   : > { %v587_v20 = vadd.f32 %v1033_v18, %v586_v19  ;;  %v1119_v21 = vpop.f32.mrb[1].mxu0 }
 0x1f5   : > { %v589_v22 = vpop.f32.mrb[2].mxu0 }
 0x1f6   : > { %v1043_v23 = vmul.f32 -1.442695, %v587_v20  ;;  %v590_v24 = vadd.f32 %v1033_v18, %v589_v22  ;;  %v1120_v25 = vpop.f32.mrb[3].mxu0 }
 0x1f8   : > { %1385 = vpow2.f32 %v1043_v23  ;;  %v1044_v26 = vmul.f32 -1.442695, %v590_v24 }
 0x1fa   : > { %1387 = vpow2.f32 %v1044_v26 }
 0x202   : > { %v1386_v27 = vpop.eup %1385 }
 0x203   : > { %v599_v28 = vadd.f32 1.0, %v1386_v27 }
 0x204   : > { %v1388_v29 = vpop.eup %1387 }
 0x205   : > { %1389 = vrcp.f32 %v599_v28  ;;  %v600_v30 = vadd.f32 1.0, %v1388_v29 }
 0x207   : > { %1391 = vrcp.f32 %v600_v30 }
 0x20f   : > { %v1390_v31 = vpop.eup %1389 }
 0x210   : > { %v605_v33 = vmul.f32 %v1390_v31, %v587_v20 }
 0x211   : > { %v1392_v32 = vpop.eup %1391 }
 0x212   : > { %v606_v34 = vmul.f32 %v1392_v32, %v590_v24 }
 0x214   : > { %v624_v35 = vpack.c.bf16 %v606_v34, %v605_v33 }
 0x216   : > { %1138 = vmatmul.mubr.bf16.vlgmr.msra.gmra.mrb[0].mxu1 %v624_v35 }
 0x2e9   : > { %v713_v45 = vpop.f32.mrb[0].mxu1 }
 0x2ea   : > { %v714_v46 = vadd.f32 %v1045_v44, %v713_v45  ;;  %v1139_v47 = vpop.f32.mrb[1].mxu1 }
 0x2eb   : > { %v716_v48 = vpop.f32.mrb[2].mxu1 }
 0x2ec   : > { %v1054_v49 = vmul.f32 -1.442695, %v714_v46  ;;  %v717_v50 = vadd.f32 %v1045_v44, %v716_v48  ;;  %v1140_v51 = vpop.f32.mrb[3].mxu1 }
 0x2ee   : > { %1393 = vpow2.f32 %v1054_v49  ;;  %v1055_v52 = vmul.f32 -1.442695, %v717_v50 }
 0x2f0   : > { %1395 = vpow2.f32 %v1055_v52 }
 0x2f8   : > { %v1394_v53 = vpop.eup %1393 }
 0x2f9   : > { %v726_v54 = vadd.f32 1.0, %v1394_v53 }
 0x2fa   : > { %v1396_v55 = vpop.eup %1395 }
 0x2fb   : > { %1397 = vrcp.f32 %v726_v54  ;;  %v727_v56 = vadd.f32 1.0, %v1396_v55 }
 0x2fd   : > { %1399 = vrcp.f32 %v727_v56 }
 0x305   : > { %v1398_v57 = vpop.eup %1397 }
 0x306   : > { %v732_v59 = vmul.f32 %v1398_v57, %v714_v46 }
 0x307   : > { %v1400_v58 = vpop.eup %1399 }
 0x308   : > { %v733_v60 = vmul.f32 %v1400_v58, %v717_v50 }
 0x30a   : > { %v751_v61 = vpack.c.bf16 %v733_v60, %v732_v59 }
 0x30c   : > { %1158 = vmatmul.mubr.bf16.vlgmr.msra.gmra.mrb[4].mxu0 %v751_v61 }
 0x3df   : > { %v840_v63 = vpop.f32.mrb[4].mxu0 }
 0x3e0   : > { %v841_v0 = vadd.f32 %v1056_v62, %v840_v63  ;;  %v1159_v1 = vpop.f32.mrb[5].mxu0 }
 0x3e1   : > { %v843_v2 = vpop.f32.mrb[6].mxu0 }
 0x3e2   : > { %847 = vst [vmem:[%s447_s8] sm:$0xff] %v841_v0  ;;  %v844_v3 = vadd.f32 %v1056_v62, %v843_v2  ;;  %v1160_v4 = vpop.f32.mrb[7].mxu0 }
 0x3e4   : > { %848 = vst [vmem:[%s447_s8 + $0x8] sm:$0xff] %v844_v3 }
 0x3e5   : > { %1556 = shalt.err (!%p1553_p8)
}
 0x3e6   : > { %s1557_s14 = scalar_lea.hbm %s2282_s15, 256  ;;  %s1561_s5 = scalar_lea.hbm %s2486_s18, 512 }
 0x3e7   : > { %p1558_p6 = scmp.ne.s32.totalorder %s2282_s15, %s1557_s14  ;;  %p1562_p0 = scmp.lt.u32.totalorder %s2282_s15, %s2486_s18 }
 0x3e8   : > { %p1563_p11 = scmp.lt.u32.totalorder %s1561_s5, %s1557_s14  ;;  %p1565_p3 = scmp.lt.u32.totalorder %s1557_s14, %s2282_s15 }
 0x3e9   : > { %p1559_p9 = pnand %p1558_p6, %p2483_p2 }
 0x3ea   : > { %p1564_p1 = por %p1563_p11, %p1562_p0 }
 0x3eb   : > { %p1560_p4 = pneg %p1559_p9 }
 0x3ec   : > { %p1566_p5 = por %p1565_p3, %p1564_p1 }
 0x3ee   : > { %p1567_p7 = pnand %p1566_p5, %p1560_p4 }
 0x3f0   : > { %1570 = shalt.err (!%p1567_p7)
}
 0x3f1   : > { %s1732_s19 = smov 128   ;;  %s1733_s28 = smov 8  }
 0x3f2   : > { %1183 = dma.vmem_to_hbm [thread:$0]  (%p2483_p2), %s2277_s6, 256, %s2282_s15, %s2284_s9, %s1732_s19, %s1732_s19, %s1733_s28  }
 0x3f3 PF: > { %s882_s20 = sand.u32 1, %s1659_s0   ;;  %p2487_p10 = scmp.ne.s32.totalorder %s2437_s2, 0 }
 0x3f4   : > { %p2488_p13 = scmp.ge.s32.totalorder %s1719_s16, 2  ;;  %s883_s4 = scalar_lea.sflag [#allocation7], %s882_s20 }
 0x3f6   : > { %p1210_p12 = pnand %p2488_p13, %p2487_p10 }
 0x3f8   : > { %1654 = dma.done.wait (!%p1210_p12), %s883_s4, 256  }
 0x3f9   : > { %1656 = vsyncadd (!%p1210_p12), %s883_s4, 4294967040  ;;  %s2489_s16 = sld [smem:[#allocation43_spill]]  ;;  %s2490_s29 = sld [smem:[#allocation32_spill]] }
 0x3fa   : > { %s2491_s24 = sld [smem:[#allocation47_spill]]  ;;  %s2492_s25 = sld [smem:[#allocation34_spill]] }
 0x3fb   : > { %s2493_s26 = sld [smem:[#allocation35_spill]]  ;;  %s2494_s27 = sld [smem:[#allocation46_spill]] }
 0x3fc   : > { %s2495_s28 = sld [smem:[#allocation36_spill]]  ;;  %s2496_s8 = sld [smem:[#allocation37_spill]] }
 0x3fd   : > { %s2497_s30 = sld [smem:[#allocation45_spill]]  ;;  %s2498_s10 = sld [smem:[#allocation38_spill]] }
 0x3fe   : > { %s2499_s11 = sld [smem:[#allocation39_spill]]  ;;  %s2500_s12 = sld [smem:[#allocation44_spill]] }
 0x3ff   : > { %s2501_s13 = sld [smem:[#allocation41_spill]]  ;;  %s2502_s14 = sld [smem:[#allocation42_spill]] }
 0x400   : > { %s2503_s15 = sld [smem:[#allocation48_spill]]  ;;  %p32_p2 = scmp.ge.s32.totalorder %s2489_s16, 4  }
 0x401   : > { %s2504_s0 = smov %s1663_s1  ;;  %s2506_s1 = smov %s2490_s29 }
 0x402   : > { %s2507_s29 = smov %s2496_s8  ;;  %34 = sbr.rel (!%p32_p2) target bundleno = 38 (0x26), region = 117 }
 0x409   :  { %888 = vsyncpa [#allocation6], 1 }
 0x40a   :  { %890 = vsyncpa [#allocation6 + $0x1], 1 }
 0x40b   :  { %891 = vsyncpa [#allocation9], 1 }
 0x40c   :  { %892 = vsyncpa [#allocation12], 1 }
 0x40d   :  { %893 = vsyncpa [#allocation7], 1 }
 0x40e   :  { %895 = vsyncpa [#allocation7 + $0x1], 1 }

// kernel: tpu_custom_call.1
= control target key start
LH: loop header
LB: loop body
LE: loop exit
PB: predicated region body
PF: predicated region fallthrough
CT: control target
= control target key end

     0   :  { %s2521_s0 = inlined_call_operand.hbm [shape: s32[2], index: 0, kind: input, shape index: {}]   ;;  %s2522_s2 = inlined_call_operand.hbm [shape: bf16[2,16,128], index: 2, kind: input, shape index: {}]   ;;  %s2523_s3 = inlined_call_operand.hbm [shape: bf16[2,128,128], index: 3, kind: input, shape index: {}]   ;;  %s2524_s4 = inlined_call_operand.vmem [shape: f32[2,1,128], index: 4, kind: input, shape index: {}]   ;;  %s2525_s5 = inlined_call_operand.hbm [shape: bf16[2,128,128], index: 5, kind: input, shape index: {}]   ;;  %s2526_s6 = inlined_call_operand.vmem [shape: f32[2,1,128], index: 6, kind: input, shape index: {}]   ;;  %s2527_s7 = inlined_call_operand.hbm [shape: bf16[2,128,128], index: 7, kind: input, shape index: {}]   ;;  %s2528_s8 = inlined_call_operand.vmem [shape: f32[2,1,128], index: 8, kind: input, shape index: {}]   ;;  %s2529_s9 = inlined_call_operand.hbm [shape: f32[2,16,128], index: 9, kind: output, shape index: {}]   ;;  %s2530_s1 = inlined_call_operand.vmem [shape: s32[2], index: 1, kind: input, shape index: {}]  }
   0x1   :  { %2557 = sst [smem:[#allocation45_spill]] %s2522_s2  ;;  %s1468_s11 = scalar_lea.hbm %s2521_s0, 16 }
   0x2   :  { %2558 = sst [smem:[#allocation46_spill]] %s2523_s3  ;;  %p1469_p0 = scmp.ne.s32.totalorder %s2521_s0, %s1468_s11 }
   0x3   :  { %2559 = sst [smem:[#allocation47_spill]] %s2524_s4  ;;  %p1472_p1 = scmp.lt.u32.totalorder %s1468_s11, %s2521_s0 }
   0x4   :  { %2560 = sst [smem:[#allocation48_spill]] %s2525_s5 }
   0x5   :  { %2561 = sst [smem:[#allocation49_spill]] %s2526_s6  ;;  %p1474_p2 = pnand %p1472_p1, %p1469_p0 }
   0x6   :  { %2562 = sst [smem:[#allocation50_spill]] %s2527_s7 }
   0x7   :  { %2563 = sst [smem:[#allocation51_spill]] %s2528_s8 }
   0x8   :  { %2564 = sst [smem:[#allocation52_spill]] %s2529_s9 }
   0x9   :  { %1477 = shalt.err (!%p1474_p2)  }
   0xa   :  { %s1788_s16 = smov [#allocation3]   ;;  %s16_s21 = sshll.u32 %s2530_s1, 4  ;;  %s17_s21 = int_to_ptr.vmem [resolvable:$true] %s16_s21 }
   0xb   :  { %15 = dma.hbm_to_smem %s2521_s0, 16, %s1788_s16, [#allocation2] }
   0xc   :  { %s1478_s22 = scalar_lea.vmem %s17_s21, 16  ;;  %p1483_p4 = scmp.lt.s32.totalorder %s17_s21, %s17_s21 }
   0xd   :  { %p1479_p3 = scmp.ne.s32.totalorder %s17_s21, %s1478_s22  ;;  %p1484_p5 = scmp.lt.s32.totalorder %s1478_s22, %s1478_s22 }
   0xf   :  { %p1485_p6 = por %p1484_p5, %p1483_p4 }
  0x11   :  { %p1486_p7 = pnand %p1485_p6, %p1479_p3 }
  0x13   :  { %1489 = shalt.err (!%p1486_p7)  }
  0x14   :  { %s1789_s23 = smov [#allocation4]  }
  0x15   :  { %19 = dma.vmem_to_smem %s17_s21, 16, %s1789_s23, [#allocation2] }
  0x16   :  { %1702 = dma.done.wait [#allocation2], 32 }
  0x17   :  { %1703 = vsyncadd [#allocation2], 4294967264 }
  0x18   :  { %21 = sfence }
  0x19   :  { %22 = vsyncpa [#allocation6], 0 }
  0x1a   :  { %24 = vsyncpa [#allocation6 + $0x1], 0 }
  0x1b   :  { %25 = vsyncpa [#allocation9], 0 }
  0x1c   :  { %27 = vsyncpa [#allocation9 + $0x1], 0 }
  0x1d   :  { %28 = vsyncpa [#allocation12], 0 }
  0x1e   :  { %30 = vsyncpa [#allocation12 + $0x1], 0 }
  0x1f   :  { %31 = vsyncpa [#allocation7], 0 }
  0x20   :  { %33 = vsyncpa [#allocation7 + $0x1], 0  ;;  %s1866_s0 = smov 0   ;;  %s1868_s1 = smov 0  }
  0x21   :  { %s1870_s24 = smov 0   ;;  %s1872_s25 = smov 0  }
  0x22   :  { %s1874_s26 = smov 0   ;;  %s1876_s27 = smov 0  }
  0x23   :  { %s1878_s28 = smov 0   ;;  %s1880_s29 = smov 0  }
  0x24   :  { %s1882_s30 = smov 0   ;;  %s1884_s10 = smov 0  }
  0x25   :  { %s1886_s11 = smov 0   ;;  %s1888_s12 = smov 0  }
  0x26   :  { %s1890_s13 = smov 0   ;;  %s1892_s14 = smov 0  }
  0x27   :  { %s1894_s15 = smov 0   ;;  %s1896_s16 = smov 0  }
  0x28 LB: > { %2565 = sst [smem:[#allocation32_spill]] %s1726_s0  ;;  %s1945_s17 = sadd.s32 4294967295, %s1786_s16   ;;  %s1786_s16 = sphi %s1896_s16, %s2654_s16   ;;  %s1782_s15 = sphi %s1894_s15, %s2642_s15   ;;  %s1778_s14 = sphi %s1892_s14, %s2653_s14   ;;  %s1774_s13 = sphi %s1890_s13, %s2652_s13   ;;  %s1770_s12 = sphi %s1888_s12, %s2640_s12   ;;  %s1766_s11 = sphi %s1886_s11, %s2651_s11   ;;  %s1762_s10 = sphi %s1884_s10, %s2638_s10   ;;  %s1758_s30 = sphi %s1882_s30, %s2650_s30   ;;  %s1754_s29 = sphi %s1880_s29, %s2649_s29   ;;  %s1750_s28 = sphi %s1878_s28, %s2648_s28   ;;  %s1746_s27 = sphi %s1876_s27, %s2647_s27   ;;  %s1742_s26 = sphi %s1874_s26, %s2646_s26   ;;  %s1738_s25 = sphi %s1872_s25, %s2645_s25   ;;  %s1734_s24 = sphi %s1870_s24, %s2636_s24   ;;  %s1730_s1 = sphi %s1868_s1, %s2644_s1   ;;  %s1726_s0 = sphi %s1866_s0, %s2643_s0  }
  0x29   : > { %2566 = sst [smem:[#allocation33_spill]] %s1734_s24  ;;  %s1088_s18 = sadd.s32 4294967294, %s1786_s16  }
  0x2a   : > { %2567 = sst [smem:[#allocation34_spill]] %s1738_s25  ;;  %s1949_s19 = sadd.s32 1, %s1786_s16  }
  0x2b   : > { %2568 = sst [smem:[#allocation35_spill]] %s1766_s11  ;;  %p2544_p8 = scmp.eq.s32.totalorder %s1786_s16, 0 }
  0x2c   : > { %2569 = sst [smem:[#allocation36_spill]] %s1770_s12  ;;  %p2543_p9 = scmp.eq.s32.totalorder %s1945_s17, 0 }
  0x2d   : > { %2570 = sst [smem:[#allocation37_spill]] %s1782_s15  ;;  %s80_s22 = sadd.s32 1, %s1770_s12 }
  0x2e   : > { %s75_s20 = sld [smem:[#allocation3 + %s1786_s16]]  ;;  %p87_p10 = scmp.ne.s32.totalorder %s1770_s12, %s1766_s11 }
  0x2f   : > { %s76_s21 = sld [smem:[#allocation3 + %s1949_s19]]  ;;  %p93_p11 = scmp.ne.s32.totalorder %s1766_s11, %s1762_s10 }
  0x30   : > { %s243_s23 = sld [smem:[#allocation3 + %s1786_s16]]  ;;  %p1963_p12 = por %p87_p10, %p2544_p8 }
  0x31   : > { %s244_s9 = sld [smem:[#allocation4 + %s1786_s16]]  ;;  %p1969_p13 = por %p93_p11, %p2543_p9 }
  0x32   : > { %s245_s4 = sld [smem:[#allocation3 + %s1949_s19]]  ;;  %s252_s5 = sadd.s32 1, %s1734_s24 }
  0x33   : > { %s2572_s6 = scalar_select %p1969_p13, 1, 0 }
  0x34   : > { %s246_s7 = sld [smem:[#allocation4 + %s1949_s19]]  ;;  %p262_p0 = scmp.ne.s32.totalorder %s1734_s24, %s1730_s1 }
  0x35   : > { %2573 = sst [smem:[#allocation38_spill]] %s2572_s6  ;;  %s77_s10 = ssub.s32 %s75_s20, %s76_s21 }
  0x36   : > { %p263_p1 = scmp.eq.s32.totalorder %s1945_s17, 1  ;;  %p78_p2 = scmp.eq.s32.totalorder %s77_s10, 0 }
  0x37   : > { %p268_p3 = scmp.ne.s32.totalorder %s1730_s1, %s1726_s0  ;;  %p269_p5 = scmp.eq.s32.totalorder %s1088_s18, 1 }
  0x38   : > { %p1981_p4 = por %p263_p1, %p262_p0  ;;  %s247_s25 = ssub.s32 %s243_s23, %s245_s4 }
  0x39   : > { %s1986_s6 = scalar_select %p78_p2, %s1770_s12, %s80_s22  }
  0x3a   : > { %s2574_s11 = scalar_select %p1981_p4, 1, 0 }
  0x3b   : > { %2575 = sst [smem:[#allocation39_spill]] %s1986_s6  ;;  %s248_s20 = ssub.s32 %s244_s9, %s246_s7 }
  0x3c   : > { %s249_s21 = sor.u32 %s248_s20, %s247_s25  ;;  %p1988_p6 = por %p269_p5, %p268_p3 }
  0x3d   : > { %p250_p7 = scmp.eq.s32.totalorder %s249_s21, 0  ;;  %p2542_p11 = scmp.lt.s32.totalorder %s1786_s16, 2 }
  0x3e   : > { %s2576_s10 = scalar_select %p1988_p6, 1, 0 }
  0x3f   : > { %s1995_s0 = scalar_select %p250_p7, %s1734_s24, %s252_s5  }
  0x40   : > { %2577 = sst [smem:[#allocation40_spill]] %s2576_s10  ;;  %s314_s18 = sand.u32 1, %s1786_s16  }
  0x41   : > { %2578 = sst [smem:[#allocation41_spill]] %s1995_s0  ;;  %s316_s22 = sand.u32 1, %s1770_s12  }
  0x42   : > { %s1095_s6 = sshll.u32 %s316_s22, 6  ;;  %p2003_p0 = pnand %p2542_p11, %p1963_p12 }
  0x43   : > { %p1104_p1 = scmp.ge.s32.totalorder %s1786_s16, 1  ;;  %s318_s5 = scalar_lea.vmem [#allocation8], %s1095_s6 }
  0x44   : > { %s1243_s7 = scalar_select %p1963_p12, [#allocation3], [#allocation16] }
  0x45   : > { %s1244_s9 = scalar_select %p1963_p12, %s1786_s16, 0 }
  0x46   : > { %s2656_s7 = smov (!%p2542_p11, %s1243_s7), [#allocation23]  ;;  %s326_s25 = sshll.u32 %s318_s5, 4  ;;  %s2017_s25 = int_to_ptr.vmem [resolvable:$true] %s326_s25 }
  0x47   : > { %s2658_s9 = smov (!%p2542_p11, %s1244_s9), 0  ;;  %p402_p2 = scmp.lt.s32.totalorder %s1786_s16, 3 }
  0x48   : > { %s319_s23 = sld [smem:[%s2656_s7 + %s2658_s9]]  ;;  %s2041_s9 = scalar_lea.sflag [#allocation9], %s314_s18 }
  0x49   : > { %p2020_p3 = pnand %p1104_p1, %p402_p2  ;;  %s2025_s21 = sld [smem:[#allocation3 + %s1786_s16]] }
  0x4a   : > { %s2028_s8 = sld [smem:[#allocation4 + %s1786_s16]]  ;;  %p1492_p5 = pneg %p2003_p0 }
  0x4b   : > { %s2580_s20 = scalar_select %p2020_p3, 1, 0 }
  0x4c   : > { %s2031_s12 = sld [smem:[#allocation3 + %s1949_s19]] }
  0x4d   : > { %2581 = sst [smem:[#allocation42_spill]] %s2580_s20  ;;  %s2582_s3 = sld [smem:[#allocation46_spill]] }
  0x4e   : > { %s1148_s22 = sshll.u32 %s319_s23, 10  ;;  %s2039_s7 = sld [smem:[#allocation4 + %s1949_s19]] }
  0x53   : > { %s2036_s6 = scalar_lea.hbm %s2582_s3, %s1148_s22  ;;  %s1495_s24 = scalar_lea.hbm %s2582_s3, 2048 }
  0x54   : > { %s1490_s5 = scalar_lea.hbm %s2036_s6, 1024  ;;  %p1496_p2 = scmp.lt.u32.totalorder %s2036_s6, %s2582_s3 }
  0x55   : > { %p1491_p12 = scmp.ne.s32.totalorder %s2036_s6, %s1490_s5  ;;  %p1497_p10 = scmp.lt.u32.totalorder %s1495_s24, %s1490_s5 }
  0x56   : > { %p1499_p9 = scmp.lt.u32.totalorder %s1490_s5, %s2036_s6 }
  0x57   : > { %p1493_p7 = pnand %p1492_p5, %p1491_p12  ;;  %p1498_p11 = por %p1497_p10, %p1496_p2 }
  0x59   : > { %p1494_p1 = pneg %p1493_p7  ;;  %p1500_p8 = por %p1499_p9, %p1498_p11 }
  0x5b   : > { %p1501_p6 = pnand %p1500_p8, %p1494_p1 }
  0x5d   : > { %1504 = shalt.err (!%p1501_p6)
}
  0x5e   : > { %s1505_s18 = scalar_lea.vmem %s2017_s25, 1024  ;;  %s1790_s23 = smov [#allocation8]  }
  0x5f   : > { %p1506_p12 = scmp.ne.s32.totalorder %s2017_s25, %s1505_s18  ;;  %s1510_s0 = sshll.u32 %s1790_s23, 4  ;;  %s1511_s0 = int_to_ptr.vmem [resolvable:$false] %s1510_s0 }
  0x60   : > { %s1512_s10 = scalar_lea.vmem %s1511_s0, 2048  ;;  %p1513_p13 = scmp.lt.s32.totalorder %s2017_s25, %s1511_s0 }
  0x61   : > { %p1508_p7 = pnand %p1506_p12, %p1492_p5  ;;  %p1514_p10 = scmp.lt.s32.totalorder %s1512_s10, %s1505_s18 }
  0x63   : > { %p1509_p4 = pneg %p1508_p7  ;;  %p1515_p2 = por %p1514_p10, %p1513_p13 }
  0x65   : > { %p1516_p9 = pnand %p1515_p2, %p1509_p4 }
  0x67   : > { %1519 = shalt.err (!%p1516_p9)
}
  0x68   : > { %s2547_s5 = smov 64   ;;  %s2549_s24 = smov 4  }
  0x69   : > { %1274 = dma.hbm_to_vmem [thread:$0]  (!%p2003_p0), %s2036_s6, 1024, %s2017_s25, %s2041_s9, %s2547_s5, %s2547_s5, %s2549_s24  }
  0x6a   : > { %s52_s22 = sadd.s32 1, %s1782_s15  ;;  %p59_p8 = scmp.ne.s32.totalorder %s1782_s15, %s1778_s14 }
  0x6b   : > { %p65_p13 = scmp.ne.s32.totalorder %s1778_s14, %s1774_s13  ;;  %s2551_s18 = sand.u32 1, %s1782_s15  }
  0x6c   : > { %p2583_p4 = scmp.eq.s32.totalorder %s1786_s16, 0  ;;  %s47_s4 = ssub.s32 %s2025_s21, %s2031_s12 }
  0x6d   : > { %p2585_p11 = scmp.eq.s32.totalorder %s1945_s17, 0  ;;  %s48_s6 = ssub.s32 %s2028_s8, %s2039_s7 }
  0x6e   : > { %p2080_p6 = por %p2583_p4, %p59_p8  ;;  %s1091_s13 = sshll.u32 %s2551_s18, 3 }
  0x6f   : > { %p2088_p5 = por %p2585_p11, %p65_p13  ;;  %s49_s0 = sor.u32 %s48_s6, %s47_s4 }
  0x70   : > { %p50_p0 = scmp.eq.s32.totalorder %s49_s0, 0  ;;  %s293_s10 = scalar_lea.vmem [#allocation5], %s1091_s13 }
  0x71   : > { %s2586_s25 = scalar_select %p2088_p5, 1, 0 }
  0x72   : > { %s304_s5 = sshll.u32 %s293_s10, 4  ;;  %p2588_p1 = scmp.lt.s32.totalorder %s1786_s16, 2  ;;  %s2110_s5 = int_to_ptr.vmem [resolvable:$true] %s304_s5 }
  0x73   : > { %s1238_s12 = scalar_select %p2080_p6, [#allocation3], [#allocation14] }
  0x74   : > { %s2099_s21 = scalar_select %p50_p0, %s1782_s15, %s52_s22  }
  0x75   : > { %s1239_s24 = scalar_select %p2080_p6, %s1786_s16, 0 }
  0x76   : > { %2587 = sst [smem:[#allocation43_spill]] %s2099_s21  ;;  %s2660_s12 = smov (!%p2588_p1, %s1238_s12), [#allocation21] }
  0x77   : > { %p2589_p12 = pmov %p2588_p1  ;;  %p2590_p7 = pmov %p2588_p1 }
  0x78   : > { %s1240_s8 = scalar_select %p2080_p6, [#allocation4], [#allocation15] }
  0x79   : > { %s2662_s24 = smov (!%p2589_p12, %s1239_s24), 0  ;;  %p2591_p10 = pmov %p2588_p1 }
  0x7a   : > { %s294_s7 = sld [smem:[%s2660_s12 + %s2662_s24]]  ;;  %s2664_s8 = smov (!%p2590_p7, %s1240_s8), [#allocation22] }
  0x7b   : > { %p2118_p2 = pnand %p2591_p10, %p2080_p6  ;;  %s295_s4 = sld [smem:[%s2664_s8 + %s2662_s24]] }
  0x7c   : > { %s2123_s13 = sld [smem:[#allocation3 + %s1786_s16]]  ;;  %p143_p9 = scmp.ne.s32.totalorder %s1758_s30, %s1754_s29 }
  0x7d   : > { %s2126_s0 = sld [smem:[#allocation3 + %s1949_s19]]  ;;  %p149_p8 = scmp.ne.s32.totalorder %s1754_s29, %s1750_s28 }
  0x7e   : > { %p2593_p13 = pmov %p2583_p4  ;;  %p2595_p6 = pmov %p2585_p11 }
  0x7f   : > { %s2597_s2 = sld [smem:[#allocation45_spill]]  ;;  %s346_s28 = sand.u32 1, %s1758_s30  }
  0x80   : > { %s1093_s6 = sshll.u32 %s294_s7, 1  ;;  %p2135_p4 = por %p143_p9, %p2593_p13 }
  0x81   : > { %s1092_s12 = sshll.u32 %s295_s4, 1  ;;  %p2141_p11 = por %p149_p8, %p2595_p6 }
  0x82   : > { %s301_s18 = sadd.s32 %s1093_s6, %s1092_s12  ;;  %s2598_s4 = sand.u32 1, %s1782_s15  }
  0x83   : > { %s1094_s3 = sshll.u32 %s301_s18, 6  ;;  %s2153_s6 = scalar_lea.sflag [#allocation6], %s2598_s4 }
  0x84   : > { %s2596_s24 = scalar_select %p2141_p11, 1, 0 }
  0x85   : > { %s2148_s21 = scalar_lea.hbm %s2597_s2, %s1094_s3  ;;  %p1522_p1 = pneg %p2118_p2 }
  0x86   : > { %s1520_s12 = scalar_lea.hbm %s2148_s21, 128  ;;  %s1525_s3 = scalar_lea.hbm %s2597_s2, 256 }
  0x87   : > { %p1521_p0 = scmp.ne.s32.totalorder %s2148_s21, %s1520_s12  ;;  %p1526_p10 = scmp.lt.u32.totalorder %s2148_s21, %s2597_s2 }
  0x88   : > { %p1527_p9 = scmp.lt.u32.totalorder %s1525_s3, %s1520_s12  ;;  %p1529_p13 = scmp.lt.u32.totalorder %s1520_s12, %s2148_s21 }
  0x89   : > { %p1523_p12 = pnand %p1522_p1, %p1521_p0 }
  0x8a   : > { %p1528_p8 = por %p1527_p9, %p1526_p10 }
  0x8b   : > { %p1524_p7 = pneg %p1523_p12 }
  0x8c   : > { %p1530_p6 = por %p1529_p13, %p1528_p8 }
  0x8e   : > { %p1531_p11 = pnand %p1530_p6, %p1524_p7 }
  0x90   : > { %1534 = shalt.err (!%p1531_p11)
}
  0x91   : > { %s1535_s4 = scalar_lea.vmem %s2110_s5, 128  ;;  %s1793_s18 = smov [#allocation5]  }
  0x92   : > { %p1536_p0 = scmp.ne.s32.totalorder %s2110_s5, %s1535_s4  ;;  %s1540_s8 = sshll.u32 %s1793_s18, 4  ;;  %s1541_s8 = int_to_ptr.vmem [resolvable:$false] %s1540_s8 }
  0x93   : > { %s1542_s10 = scalar_lea.vmem %s1541_s8, 256  ;;  %p1543_p3 = scmp.lt.s32.totalorder %s2110_s5, %s1541_s8 }
  0x94   : > { %p1538_p12 = pnand %p1536_p0, %p1522_p1  ;;  %p1544_p10 = scmp.lt.s32.totalorder %s1542_s10, %s1535_s4 }
  0x96   : > { %p1539_p5 = pneg %p1538_p12  ;;  %p1545_p9 = por %p1544_p10, %p1543_p3 }
  0x98   : > { %p1546_p8 = pnand %p1545_p9, %p1539_p5 }
  0x9a   : > { %1549 = shalt.err (!%p1546_p8)
}
  0x9b   : > { %s2599_s12 = smov 4   ;;  %s2600_s3 = smov 64  }
  0x9c   : > { %1269 = dma.hbm_to_vmem [thread:$0]  (!%p2118_p2), %s2148_s21, 128, %s2110_s5, %s2153_s6, %s2600_s3, %s2600_s3, %s2599_s12  }
  0x9d   : > { %s133_s22 = ssub.s32 %s2123_s13, %s2126_s0  ;;  %s1098_s7 = sshll.u32 %s346_s28, 6 }
  0x9e   : > { %p134_p3 = scmp.eq.s32.totalorder %s133_s22, 0  ;;  %s2601_s4 = sld [smem:[#allocation34_spill]] }
  0x9f   : > { %s1246_s18 = scalar_select %p2135_p4, [#allocation3], [#allocation17] }
  0xa0   : > { %s2602_s8 = sadd.s32 1, %s1758_s30  ;;  %p2604_p5 = scmp.lt.s32.totalorder %s1786_s16, 2 }
  0xa1   : > { %s2193_s10 = scalar_select %p134_p3, %s1758_s30, %s2602_s8  }
  0xa2   : > { %s1247_s2 = scalar_select %p2135_p4, %s1786_s16, 0 }
  0xa3   : > { %2603 = sst [smem:[#allocation44_spill]] %s2193_s10  ;;  %s2666_s18 = smov (!%p2604_p5, %s1246_s18), [#allocation24] }
  0xa4   : > { %p2605_p11 = pmov %p2604_p5  ;;  %p2606_p2 = pmov %p2604_p5 }
  0xa5   : > { %s348_s13 = scalar_lea.vmem [#allocation10], %s1098_s7  ;;  %s2211_s28 = sld [smem:[#allocation3 + %s1786_s16]] }
  0xa6   : > { %s2668_s2 = smov (!%p2605_p11, %s1247_s2), 0  ;;  %p2206_p1 = pnand %p2606_p2, %p2135_p4 }
  0xa7   : > { %s349_s21 = sld [smem:[%s2666_s18 + %s2668_s2]]  ;;  %s356_s0 = sshll.u32 %s348_s13, 4  ;;  %s2213_s0 = int_to_ptr.vmem [resolvable:$true] %s356_s0 }
  0xa8   : > { %s2216_s6 = sld [smem:[#allocation3 + %s1949_s19]]  ;;  %p205_p4 = scmp.ne.s32.totalorder %s1742_s26, %s2601_s4 }
  0xa9   : > { %s2608_s15 = sld [smem:[#allocation48_spill]]  ;;  %p1552_p6 = pneg %p2206_p1 }
  0xad   : > { %s1149_s22 = sshll.u32 %s349_s21, 10 }
  0xaf   : > { %s2609_s20 = smov %s2608_s15  ;;  %s2223_s10 = scalar_lea.hbm %s2608_s15, %s1149_s22 }
  0xb0   : > { %s1550_s2 = scalar_lea.hbm %s2223_s10, 1024  ;;  %s1555_s21 = scalar_lea.hbm %s2609_s20, 2048 }
  0xb1   : > { %p1551_p13 = scmp.ne.s32.totalorder %s2223_s10, %s1550_s2  ;;  %p1556_p10 = scmp.lt.u32.totalorder %s2223_s10, %s2609_s20 }
  0xb2   : > { %p1557_p9 = scmp.lt.u32.totalorder %s1555_s21, %s1550_s2  ;;  %p1559_p3 = scmp.lt.u32.totalorder %s1550_s2, %s2223_s10 }
  0xb3   : > { %p1553_p0 = pnand %p1552_p6, %p1551_p13 }
  0xb4   : > { %p1558_p8 = por %p1557_p9, %p1556_p10 }
  0xb5   : > { %p1554_p12 = pneg %p1553_p0 }
  0xb6   : > { %p1560_p5 = por %p1559_p3, %p1558_p8 }
  0xb8   : > { %p1561_p11 = pnand %p1560_p5, %p1554_p12 }
  0xba   : > { %1564 = shalt.err (!%p1561_p11)
}
  0xbb   : > { %s1565_s22 = scalar_lea.vmem %s2213_s0, 1024  ;;  %s1794_s8 = smov [#allocation10]  }
  0xbc   : > { %p1566_p2 = scmp.ne.s32.totalorder %s2213_s0, %s1565_s22  ;;  %s1570_s23 = sshll.u32 %s1794_s8, 4  ;;  %s1571_s23 = int_to_ptr.vmem [resolvable:$false] %s1570_s23 }
  0xbd   : > { %s1572_s7 = scalar_lea.vmem %s1571_s23, 2048  ;;  %p1573_p7 = scmp.lt.s32.totalorder %s2213_s0, %s1571_s23 }
  0xbe   : > { %p1568_p13 = pnand %p1566_p2, %p1552_p6  ;;  %p1574_p10 = scmp.lt.s32.totalorder %s1572_s7, %s1565_s22 }
  0xc0   : > { %p1569_p0 = pneg %p1568_p13  ;;  %p1575_p9 = por %p1574_p10, %p1573_p7 }
  0xc2   : > { %p1576_p8 = pnand %p1575_p9, %p1569_p0 }
  0xc4   : > { %1579 = shalt.err (!%p1576_p8)
}
  0xc5   : > { %1279 = dma.hbm_to_vmem [thread:$0]  (!%p2206_p1), %s2223_s10, 1024, %s2213_s0, %s2041_s9, %s2600_s3, %s2600_s3, %s2599_s12  }
  0xc6   : > { %p2610_p7 = scmp.eq.s32.totalorder %s1945_s17, 0  ;;  %s192_s2 = sadd.s32 1, %s1746_s27 }
  0xc7   : > { %s374_s18 = sand.u32 1, %s1746_s27   ;;  %s189_s21 = ssub.s32 %s2211_s28, %s2216_s6 }
  0xc8   : > { %p2261_p6 = por %p205_p4, %p2610_p7  ;;  %p2612_p12 = scmp.eq.s32.totalorder %s1786_s16, 0 }
  0xc9   : > { %p2613_p3 = scmp.ne.s32.totalorder %s1746_s27, %s1742_s26  ;;  %p190_p11 = scmp.eq.s32.totalorder %s189_s21, 0 }
  0xca   : > { %s1101_s13 = sshll.u32 %s374_s18, 6  ;;  %p2614_p2 = scmp.lt.s32.totalorder %s1786_s16, 2 }
  0xcb   : > { %p201_p5 = por %p2613_p3, %p2612_p12  ;;  %s378_s28 = scalar_lea.vmem [#allocation11], %s1101_s13 }
  0xcc   : > { %s2281_s9 = scalar_select %p190_p11, %s1746_s27, %s192_s2  }
  0xcd   : > { %p2276_p13 = pnand %p2614_p2, %p201_p5  ;;  %p2616_p1 = pmov %p2614_p2 }
  0xce   : > { %s1249_s4 = scalar_select %p201_p5, [#allocation3], [#allocation18] }
  0xcf   : > { %s1250_s10 = scalar_select %p201_p5, %s1786_s16, 0 }
  0xd0   : > { %s2670_s4 = smov (!%p2616_p1, %s1249_s4), [#allocation25]  ;;  %p2617_p4 = pmov %p2616_p1 }
  0xd1   : > { %s386_s6 = sshll.u32 %s378_s28, 4  ;;  %s2618_s7 = sld [smem:[#allocation50_spill]]  ;;  %s2288_s6 = int_to_ptr.vmem [resolvable:$true] %s386_s6 }
  0xd2   : > { %s2672_s10 = smov (!%p2617_p4, %s1250_s10), 0  ;;  %s2295_s2 = scalar_lea.sflag [#allocation12], %s374_s18 }
  0xd3   : > { %s379_s0 = sld [smem:[%s2670_s4 + %s2672_s10]]  ;;  %p1582_p10 = pneg %p2276_p13 }
  0xd7   : > { %s1585_s10 = scalar_lea.hbm %s2618_s7, 2048 }
  0xd9   : > { %s1150_s22 = sshll.u32 %s379_s0, 10 }
  0xda   : > { %s2293_s21 = scalar_lea.hbm %s2618_s7, %s1150_s22 }
  0xdb   : > { %s1580_s20 = scalar_lea.hbm %s2293_s21, 1024  ;;  %p1586_p7 = scmp.lt.u32.totalorder %s2293_s21, %s2618_s7 }
  0xdc   : > { %p1581_p0 = scmp.ne.s32.totalorder %s2293_s21, %s1580_s20  ;;  %p1587_p12 = scmp.lt.u32.totalorder %s1585_s10, %s1580_s20 }
  0xdd   : > { %p1589_p5 = scmp.lt.u32.totalorder %s1580_s20, %s2293_s21 }
  0xde   : > { %p1583_p9 = pnand %p1582_p10, %p1581_p0  ;;  %p1588_p3 = por %p1587_p12, %p1586_p7 }
  0xe0   : > { %p1584_p8 = pneg %p1583_p9  ;;  %p1590_p11 = por %p1589_p5, %p1588_p3 }
  0xe2   : > { %p1591_p2 = pnand %p1590_p11, %p1584_p8 }
  0xe4   : > { %1594 = shalt.err (!%p1591_p2)
}
  0xe5   : > { %s1595_s18 = scalar_lea.vmem %s2288_s6, 1024  ;;  %s1795_s22 = smov [#allocation11]  }
  0xe6   : > { %p1596_p1 = scmp.ne.s32.totalorder %s2288_s6, %s1595_s18  ;;  %s1600_s8 = sshll.u32 %s1795_s22, 4  ;;  %s1601_s8 = int_to_ptr.vmem [resolvable:$false] %s1600_s8 }
  0xe7   : > { %s1602_s23 = scalar_lea.vmem %s1601_s8, 2048  ;;  %p1603_p9 = scmp.lt.s32.totalorder %s2288_s6, %s1601_s8 }
  0xe8   : > { %p1598_p4 = pnand %p1596_p1, %p1582_p10  ;;  %p1604_p7 = scmp.lt.s32.totalorder %s1602_s23, %s1595_s18 }
  0xea   : > { %p1599_p0 = pneg %p1598_p4  ;;  %p1605_p12 = por %p1604_p7, %p1603_p9 }
  0xec   : > { %p1606_p3 = pnand %p1605_p12, %p1599_p0 }
  0xee   : > { %1609 = shalt.err (!%p1606_p3)
}
  0xef   : > { %1284 = dma.hbm_to_vmem [thread:$0]  (!%p2276_p13), %s2293_s21, 1024, %s2288_s6, %s2295_s2, %s2600_s3, %s2600_s3, %s2599_s12  }
  0xf0   : > { %s2619_s20 = sld [smem:[#allocation42_spill]] }
  0xf6   : > { %p2620_p10 = scmp.ne.s32.totalorder %s2619_s20, 0 }
  0xf7   : > { %s408_s13 = sand.u32 (!%p2620_p10), 1, %s1778_s14   ;;  %p2621_p8 = scmp.ne.s32.totalorder (!%p2620_p10), %s2586_s25, 0 }
  0xf8   : > { %406 = sbr.rel (%p2620_p10) target bundleno = 1031 (0x407), region = 48  ;;  %s2329_s4 = sshll.u32 (!%p2620_p10), %s408_s13, 3 }
  0xf9   : > { %s409_s10 = scalar_lea.sflag (!%p2620_p10), [#allocation6], %s408_s13  ;;  %s412_s0 = scalar_lea.vmem (!%p2620_p10), [#allocation5], %s2329_s4 }
  0xff   : > { %1705 = dma.done.wait (%p2621_p8), %s409_s10, 128  }
 0x100   : > { %1707 = vsyncadd (%p2621_p8), %s409_s10, 4294967168  ;;  %s2622_s15 = sld [smem:[#allocation35_spill]]  ;;  %s2623_s28 = sld [smem:[#allocation38_spill]] }
 0x101   : > { %s417_s12 = sand.u32 1, %s1945_s17  }
 0x102   : > { %s418_s21 = scalar_lea.sflag [#allocation9], %s417_s12 }
 0x106   : > { %s419_s3 = sand.u32 1, %s2622_s15   ;;  %p2624_p13 = scmp.ne.s32.totalorder %s2623_s28, 0 }
 0x107   : > { %s1106_s6 = sshll.u32 %s419_s3, 6 }
 0x108   : > { %s2338_s2 = scalar_lea.vmem [#allocation8], %s1106_s6 }
 0x109   : > { %1709 = dma.done.wait (%p2624_p13), %s418_s21, 1024  }
 0x10a   : > { %1711 = vsyncadd (%p2624_p13), %s418_s21, 4294966272  ;;  %s428_s18 = sand.u32 1, %s1754_s29   ;;  %p2625_p5 = scmp.ne.s32.totalorder %s2596_s24, 0 }
 0x10b   : > { %s1107_s22 = sshll.u32 %s428_s18, 6 }
 0x10c   : > { %s2345_s25 = scalar_lea.vmem [#allocation10], %s1107_s22 }
 0x10d   : > { %1713 = dma.done.wait (%p2625_p5), %s418_s21, 1024  }
 0x10e   : > { %1715 = vsyncadd (%p2625_p5), %s418_s21, 4294966272  ;;  %s435_s8 = sand.u32 1, %s1742_s26  }
 0x10f   : > { %s1108_s23 = sshll.u32 %s435_s8, 6  ;;  %s436_s20 = scalar_lea.sflag [#allocation12], %s435_s8 }
 0x110   : > { %s2352_s13 = scalar_lea.vmem [#allocation11], %s1108_s23 }
 0x111   : > { %1717 = dma.done.wait (%p2261_p6), %s436_s20, 1024  }
 0x112   : > { %1719 = vsyncadd (%p2261_p6), %s436_s20, 4294966272  ;;  %v1796_v0 = vmov 0.0   ;;  %vm1797_vm0 = vmmov 0   ;;  %v1427_v1 = vld [vmem:[%s2338_s2] sm:$0xff]   ;;  %v1428_v2 = vld [vmem:[%s2338_s2 + $0x8] sm:$0xff]   ;;  %s501_s24 = sld [smem:[#allocation3 + %s1945_s17]] }
 0x113   : > { %1178 = vmatprep.subr.bf16.mxu0 %v1796_v0  ;;  %1194 = vmatprep.mubr.msk.bf16.mxu0 %vm1797_vm0, %v1796_v0  ;;  %v1429_v3 = vld [vmem:[%s2338_s2 + $0x10] sm:$0xff]   ;;  %v1430_v4 = vld [vmem:[%s2338_s2 + $0x18] sm:$0xff]   ;;  %v1431_v5 = vld [vmem:[%s2338_s2 + $0x20] sm:$0xff]   ;;  %s2626_s10 = sld [smem:[#allocation47_spill]]  ;;  %s2627_s3 = sld [smem:[#allocation49_spill]] }
 0x114   : > { %1198 = vmatprep.subr.bf16.mxu1 %v1796_v0  ;;  %1214 = vmatprep.mubr.msk.bf16.mxu1 %vm1797_vm0, %v1796_v0  ;;  %v1432_v6 = vld [vmem:[%s2338_s2 + $0x28] sm:$0xff]   ;;  %v1433_v7 = vld [vmem:[%s2338_s2 + $0x30] sm:$0xff]   ;;  %v1434_v8 = vld [vmem:[%s2338_s2 + $0x38] sm:$0xff]   ;;  %s507_s15 = sld [smem:[#allocation3 + %s1945_s17]]  ;;  %p2628_p2 = scmp.ne.s32.totalorder %s2574_s11, 0 }
 0x115   : > { %1179 = vmatpush3.bf16.msra.mxu0 %v1427_v1  ;;  %v1435_v9 = vld [vmem:[%s412_s0] sm:$0xff]   ;;  %v1436_v10 = vld [vmem:[%s2345_s25] sm:$0xff]   ;;  %v1437_v11 = vld [vmem:[%s2345_s25 + $0x8] sm:$0xff]   ;;  %s513_s21 = sld [smem:[#allocation3 + %s1945_s17]]  ;;  %s494_s8 = sand.u32 1, %s1730_s1  }
 0x116   : > { %1180 = vmatprep.subr.bf16.mxu0 %v1796_v0  ;;  %1199 = vmatpush3.bf16.msra.mxu1 %v1436_v10  ;;  %v1438_v12 = vld [vmem:[%s2345_s25 + $0x10] sm:$0xff]   ;;  %v1439_v13 = vld [vmem:[%s2345_s25 + $0x18] sm:$0xff]   ;;  %v1440_v14 = vld [vmem:[%s2345_s25 + $0x20] sm:$0xff]   ;;  %s1256_s2 = scalar_select %p2628_p2, [#allocation3], [#allocation19] }
 0x117   : > { %1200 = vmatprep.subr.bf16.mxu1 %v1796_v0  ;;  %v1441_v15 = vld [vmem:[%s2345_s25 + $0x28] sm:$0xff]   ;;  %v1442_v16 = vld [vmem:[%s2345_s25 + $0x30] sm:$0xff]   ;;  %v1443_v17 = vld [vmem:[%s2345_s25 + $0x38] sm:$0xff]   ;;  %s2678_s17 = smov (!%p2628_p2, %s1945_s17), 0  ;;  %s1109_s23 = sshll.u32 %s494_s8, 4 }
 0x118   : > { %p502_p6 = scmp.lt.s32.totalorder %s501_s24, 1  ;;  %v1444_v36 = vld [vmem:[%s2352_s13] sm:$0xff]   ;;  %v1445_v37 = vld [vmem:[%s2352_s13 + $0x8] sm:$0xff]   ;;  %v1446_v38 = vld [vmem:[%s2352_s13 + $0x10] sm:$0xff]   ;;  %s906_s22 = sld [smem:[%s1256_s2 + %s2678_s17]] }
 0x119   : > { %1181 = vmatpush3.bf16.msra.mxu0 %v1428_v2  ;;  %v1447_v39 = vld [vmem:[%s2352_s13 + $0x18] sm:$0xff]   ;;  %v1448_v40 = vld [vmem:[%s2352_s13 + $0x20] sm:$0xff]   ;;  %v1449_v41 = vld [vmem:[%s2352_s13 + $0x28] sm:$0xff]   ;;  %s1258_s18 = scalar_select %p2628_p2, [#allocation4], [#allocation20] }
 0x11a   : > { %1182 = vmatprep.subr.bf16.mxu0 %v1796_v0  ;;  %1201 = vmatpush3.bf16.msra.mxu1 %v1437_v11  ;;  %s2674_s24 = smov (!%p502_p6, %s501_s24), 1  ;;  %v1450_v42 = vld [vmem:[%s2352_s13 + $0x30] sm:$0xff]   ;;  %v1451_v43 = vld [vmem:[%s2352_s13 + $0x38] sm:$0xff]   ;;  %p508_p11 = scmp.lt.s32.totalorder %s507_s15, 1 }
 0x11b   : > { %1202 = vmatprep.subr.bf16.mxu1 %v1796_v0  ;;  %s504_s0 = scalar_lea.vmem %s2626_s10, %s2674_s24  ;;  %s907_s25 = sld [smem:[%s1258_s18 + %s2678_s17]] }
 0x11c   : > { %v1110_v18 = vld [vmem:[%s504_s0] ss:$0 sm:$0xff]  ;;  %s2676_s15 = smov (!%p508_p11, %s507_s15), 1  ;;  %p514_p1 = scmp.lt.s32.totalorder %s513_s21, 1 }
 0x11d   : > { %1183 = vmatpush3.bf16.msra.mxu0 %v1429_v3  ;;  %s510_s6 = scalar_lea.vmem %s2627_s3, %s2676_s15  ;;  %s2629_s4 = sld [smem:[#allocation51_spill]] }
 0x11e   : > { %1184 = vmatprep.subr.bf16.mxu0 %v1796_v0  ;;  %1203 = vmatpush3.bf16.msra.mxu1 %v1438_v12  ;;  %v1122_v44 = vld [vmem:[%s510_s6] ss:$0 sm:$0xff]  ;;  %s2680_s21 = smov (!%p514_p1, %s513_s21), 1  ;;  %s1144_s13 = sshll.u32 %s906_s22, 1 }
 0x11f   : > { %1204 = vmatprep.subr.bf16.mxu1 %v1796_v0  ;;  %s496_s15 = scalar_lea.vmem [#allocation13], %s1109_s23  ;;  %s2630_s6 = sld [smem:[#allocation52_spill]] }
 0x120   : > { %s916_s28 = sshll.u32 %s496_s15, 4  ;;  %s2441_s2 = scalar_lea.sflag [#allocation7], %s494_s8  ;;  %s2434_s28 = int_to_ptr.vmem [resolvable:$true] %s916_s28 }
 0x121   : > { %1185 = vmatpush3.bf16.msra.mxu0 %v1430_v4  ;;  %s1143_s20 = sshll.u32 %s907_s25, 1  ;;  %s1610_s18 = scalar_lea.vmem %s2434_s28, 256 }
 0x122   : > { %1186 = vmatprep.subr.bf16.mxu0 %v1796_v0  ;;  %1205 = vmatpush3.bf16.msra.mxu1 %v1439_v13  ;;  %s913_s0 = sadd.s32 %s1144_s13, %s1143_s20  ;;  %p1611_p4 = scmp.ne.s32.totalorder %s2434_s28, %s1610_s18 }
 0x123   : > { %1206 = vmatprep.subr.bf16.mxu1 %v1796_v0  ;;  %s516_s10 = scalar_lea.vmem %s2629_s4, %s2680_s21  ;;  %s1145_s12 = sshll.u32 %s913_s0, 7 }
 0x124   : > { %v1133_v62 = vld [vmem:[%s516_s10] ss:$0 sm:$0xff]  ;;  %p1612_p0 = pnand %p1611_p4, %p2628_p2  ;;  %s1798_s22 = smov [#allocation13]  }
 0x125   : > { %1187 = vmatpush3.bf16.msra.mxu0 %v1431_v5  ;;  %s2439_s21 = scalar_lea.hbm %s2630_s6, %s1145_s12  ;;  %s1614_s25 = sshll.u32 %s1798_s22, 4  ;;  %s1615_s25 = int_to_ptr.vmem [resolvable:$false] %s1614_s25 }
 0x126   : > { %1188 = vmatprep.subr.bf16.mxu0 %v1796_v0  ;;  %1207 = vmatpush3.bf16.msra.mxu1 %v1440_v14  ;;  %p1613_p9 = pneg %p1612_p0  ;;  %s1616_s23 = scalar_lea.vmem %s1615_s25, 512 }
 0x127   : > { %1208 = vmatprep.subr.bf16.mxu1 %v1796_v0  ;;  %p1617_p7 = scmp.lt.s32.totalorder %s2434_s28, %s1615_s25  ;;  %p1618_p12 = scmp.lt.s32.totalorder %s1616_s23, %s1610_s18 }
 0x129   : > { %1189 = vmatpush3.bf16.msra.mxu0 %v1432_v6  ;;  %p1619_p3 = por %p1618_p12, %p1617_p7 }
 0x12a   : > { %1190 = vmatprep.subr.bf16.mxu0 %v1796_v0  ;;  %1209 = vmatpush3.bf16.msra.mxu1 %v1441_v15 }
 0x12b   : > { %1210 = vmatprep.subr.bf16.mxu1 %v1796_v0  ;;  %p1620_p10 = pnand %p1619_p3, %p1613_p9 }
 0x12d   : > { %1191 = vmatpush3.bf16.msra.mxu0 %v1433_v7 }
 0x12e   : > { %1192 = vmatprep.subr.bf16.mxu0 %v1796_v0  ;;  %1211 = vmatpush3.bf16.msra.mxu1 %v1442_v16 }
 0x12f   : > { %1212 = vmatprep.subr.bf16.mxu1 %v1796_v0 }
 0x131   : > { %1193 = vmatpush3.bf16.msra.mxu0 %v1434_v8 }
 0x132   : > { %1218 = vmatprep.subr.bf16.mxu0 %v1796_v0  ;;  %1213 = vmatpush3.bf16.msra.mxu1 %v1443_v17 }
 0x134   : > { %1195 = vmatmul.mubr.bf16.vlgmr.msra.gmra.mrb[0].mxu0 %v1435_v9 }
 0x135   : > { %1234 = vmatprep.mubr.msk.bf16.mxu0 %vm1797_vm0, %v1796_v0  ;;  %1219 = vmatpush3.bf16.msra.mxu0 %v1444_v36 }
 0x136   : > { %1220 = vmatprep.subr.bf16.mxu0 %v1796_v0 }
 0x139   : > { %1221 = vmatpush3.bf16.msra.mxu0 %v1445_v37 }
 0x13a   : > { %1222 = vmatprep.subr.bf16.mxu0 %v1796_v0 }
 0x13d   : > { %1223 = vmatpush3.bf16.msra.mxu0 %v1446_v38 }
 0x13e   : > { %1224 = vmatprep.subr.bf16.mxu0 %v1796_v0 }
 0x141   : > { %1225 = vmatpush3.bf16.msra.mxu0 %v1447_v39 }
 0x142   : > { %1226 = vmatprep.subr.bf16.mxu0 %v1796_v0 }
 0x145   : > { %1227 = vmatpush3.bf16.msra.mxu0 %v1448_v40 }
 0x146   : > { %1228 = vmatprep.subr.bf16.mxu0 %v1796_v0 }
 0x149   : > { %1229 = vmatpush3.bf16.msra.mxu0 %v1449_v41 }
 0x14a   : > { %1230 = vmatprep.subr.bf16.mxu0 %v1796_v0 }
 0x14d   : > { %1231 = vmatpush3.bf16.msra.mxu0 %v1450_v42 }
 0x14e   : > { %1232 = vmatprep.subr.bf16.mxu0 %v1796_v0 }
 0x151   : > { %1233 = vmatpush3.bf16.msra.mxu0 %v1451_v43 }
 0x207   : > { %v635_v19 = vpop.f32.mrb[0].mxu0 }
 0x208   : > { %v636_v20 = vadd.f32 %v1110_v18, %v635_v19  ;;  %v1196_v21 = vpop.f32.mrb[1].mxu0 }
 0x209   : > { %v638_v22 = vpop.f32.mrb[2].mxu0 }
 0x20a   : > { %v1120_v23 = vmul.f32 -1.442695, %v636_v20  ;;  %v639_v24 = vadd.f32 %v1110_v18, %v638_v22  ;;  %v1197_v25 = vpop.f32.mrb[3].mxu0 }
 0x20c   : > { %1452 = vpow2.f32 %v1120_v23  ;;  %v1121_v26 = vmul.f32 -1.442695, %v639_v24 }
 0x20e   : > { %1454 = vpow2.f32 %v1121_v26 }
 0x216   : > { %v1453_v27 = vpop.eup %1452 }
 0x217   : > { %v648_v28 = vadd.f32 1.0, %v1453_v27 }
 0x218   : > { %v1455_v29 = vpop.eup %1454 }
 0x219   : > { %1456 = vrcp.f32 %v648_v28  ;;  %v649_v30 = vadd.f32 1.0, %v1455_v29 }
 0x21b   : > { %1458 = vrcp.f32 %v649_v30 }
 0x223   : > { %v1457_v31 = vpop.eup %1456 }
 0x224   : > { %v654_v33 = vmul.f32 %v1457_v31, %v636_v20 }
 0x225   : > { %v1459_v32 = vpop.eup %1458 }
 0x226   : > { %v655_v34 = vmul.f32 %v1459_v32, %v639_v24 }
 0x228   : > { %v673_v35 = vpack.c.bf16 %v655_v34, %v654_v33 }
 0x22a   : > { %1215 = vmatmul.mubr.bf16.vlgmr.msra.gmra.mrb[0].mxu1 %v673_v35 }
 0x2fd   : > { %v762_v45 = vpop.f32.mrb[0].mxu1 }
 0x2fe   : > { %v763_v46 = vadd.f32 %v1122_v44, %v762_v45  ;;  %v1216_v47 = vpop.f32.mrb[1].mxu1 }
 0x2ff   : > { %v765_v48 = vpop.f32.mrb[2].mxu1 }
 0x300   : > { %v1131_v49 = vmul.f32 -1.442695, %v763_v46  ;;  %v766_v50 = vadd.f32 %v1122_v44, %v765_v48  ;;  %v1217_v51 = vpop.f32.mrb[3].mxu1 }
 0x302   : > { %1460 = vpow2.f32 %v1131_v49  ;;  %v1132_v52 = vmul.f32 -1.442695, %v766_v50 }
 0x304   : > { %1462 = vpow2.f32 %v1132_v52 }
 0x30c   : > { %v1461_v53 = vpop.eup %1460 }
 0x30d   : > { %v775_v54 = vadd.f32 1.0, %v1461_v53 }
 0x30e   : > { %v1463_v55 = vpop.eup %1462 }
 0x30f   : > { %1464 = vrcp.f32 %v775_v54  ;;  %v776_v56 = vadd.f32 1.0, %v1463_v55 }
 0x311   : > { %1466 = vrcp.f32 %v776_v56 }
 0x319   : > { %v1465_v57 = vpop.eup %1464 }
 0x31a   : > { %v781_v59 = vmul.f32 %v1465_v57, %v763_v46 }
 0x31b   : > { %v1467_v58 = vpop.eup %1466 }
 0x31c   : > { %v782_v60 = vmul.f32 %v1467_v58, %v766_v50 }
 0x31e   : > { %v800_v61 = vpack.c.bf16 %v782_v60, %v781_v59 }
 0x320   : > { %1235 = vmatmul.mubr.bf16.vlgmr.msra.gmra.mrb[4].mxu0 %v800_v61 }
 0x3f3   : > { %v889_v63 = vpop.f32.mrb[4].mxu0 }
 0x3f4   : > { %v890_v0 = vadd.f32 %v1133_v62, %v889_v63  ;;  %v1236_v1 = vpop.f32.mrb[5].mxu0 }
 0x3f5   : > { %v892_v2 = vpop.f32.mrb[6].mxu0 }
 0x3f6   : > { %896 = vst [vmem:[%s496_s15] sm:$0xff] %v890_v0  ;;  %v893_v3 = vadd.f32 %v1133_v62, %v892_v2  ;;  %v1237_v4 = vpop.f32.mrb[7].mxu0 }
 0x3f8   : > { %897 = vst [vmem:[%s496_s15 + $0x8] sm:$0xff] %v893_v3 }
 0x3f9   : > { %1623 = shalt.err (!%p1620_p10)
}
 0x3fa   : > { %s1624_s8 = scalar_lea.hbm %s2439_s21, 256  ;;  %s1628_s24 = scalar_lea.hbm %s2630_s6, 512 }
 0x3fb   : > { %p1625_p8 = scmp.ne.s32.totalorder %s2439_s21, %s1624_s8  ;;  %p1629_p6 = scmp.lt.u32.totalorder %s2439_s21, %s2630_s6 }
 0x3fc   : > { %p1630_p11 = scmp.lt.u32.totalorder %s1628_s24, %s1624_s8  ;;  %p1632_p4 = scmp.lt.u32.totalorder %s1624_s8, %s2439_s21 }
 0x3fd   : > { %p1626_p13 = pnand %p1625_p8, %p2628_p2 }
 0x3fe   : > { %p1631_p1 = por %p1630_p11, %p1629_p6 }
 0x3ff   : > { %p1627_p5 = pneg %p1626_p13 }
 0x400   : > { %p1633_p0 = por %p1632_p4, %p1631_p1 }
 0x402   : > { %p1634_p9 = pnand %p1633_p0, %p1627_p5 }
 0x404   : > { %1637 = shalt.err (!%p1634_p9)
}
 0x405   : > { %s1799_s10 = smov 128   ;;  %s1800_s0 = smov 8  }
 0x406   : > { %1260 = dma.vmem_to_hbm [thread:$0]  (%p2628_p2), %s2434_s28, 256, %s2439_s21, %s2441_s2, %s1799_s10, %s1799_s10, %s1800_s0  }
 0x407 PF: > { %s2631_s15 = sld [smem:[#allocation32_spill]]  ;;  %s2632_s12 = sld [smem:[#allocation40_spill]] }
 0x408   : > { %p2634_p12 = scmp.ge.s32.totalorder %s1786_s16, 2 }
 0x40d   : > { %s931_s17 = sand.u32 1, %s2631_s15   ;;  %p2633_p7 = scmp.ne.s32.totalorder %s2632_s12, 0 }
 0x40e   : > { %s932_s3 = scalar_lea.sflag [#allocation7], %s931_s17 }
 0x40f   : > { %p1286_p3 = pnand %p2634_p12, %p2633_p7 }
 0x411   : > { %1721 = dma.done.wait (!%p1286_p3), %s932_s3, 256  }
 0x412   : > { %1723 = vsyncadd (!%p1286_p3), %s932_s3, 4294967040  ;;  %s2635_s18 = sld [smem:[#allocation33_spill]]  ;;  %s2636_s24 = sld [smem:[#allocation41_spill]] }
 0x413   : > { %s2637_s11 = sld [smem:[#allocation44_spill]]  ;;  %s2638_s10 = sld [smem:[#allocation35_spill]] }
 0x414   : > { %s2639_s21 = sld [smem:[#allocation36_spill]]  ;;  %s2640_s12 = sld [smem:[#allocation39_spill]] }
 0x415   : > { %s2641_s2 = sld [smem:[#allocation37_spill]]  ;;  %s2642_s15 = sld [smem:[#allocation43_spill]] }
 0x416   : > { %p36_p2 = scmp.ge.s32.totalorder %s1949_s19, 4   ;;  %s2643_s0 = smov %s1730_s1 }
 0x417   : > { %s2645_s25 = smov %s1742_s26  ;;  %s2646_s26 = smov %s1746_s27 }
 0x418   : > { %s2644_s1 = smov %s2635_s18  ;;  %s2647_s27 = smov %s2281_s9 }
 0x419   : > { %s2648_s28 = smov %s1754_s29  ;;  %s2649_s29 = smov %s1758_s30 }
 0x41a   : > { %s2650_s30 = smov %s2637_s11  ;;  %s2651_s11 = smov %s2639_s21 }
 0x41b   : > { %s2652_s13 = smov %s1778_s14  ;;  %s2653_s14 = smov %s2641_s2 }
 0x41c   : > { %s2654_s16 = smov %s1949_s19  ;;  %38 = sbr.rel (!%p36_p2) target bundleno = 40 (0x28), region = 139 }
 0x423   :  { %937 = vsyncpa [#allocation6], 1 }
 0x424   :  { %939 = vsyncpa [#allocation6 + $0x1], 1 }
 0x425   :  { %940 = vsyncpa [#allocation9], 1 }
 0x426   :  { %942 = vsyncpa [#allocation9 + $0x1], 1 }
 0x427   :  { %943 = vsyncpa [#allocation12], 1 }
 0x428   :  { %945 = vsyncpa [#allocation12 + $0x1], 1 }
 0x429   :  { %946 = vsyncpa [#allocation7], 1 }
 0x42a   :  { %948 = vsyncpa [#allocation7 + $0x1], 1 }

</bundles_post_ra>
